<compile_context>
chip_gen: v5e
topology: v5e:2x2
jax: 0.10.0
libtpu: 0.0.40
codegen_flags: <defaults>
</compile_context>

<pallas_src>
import functools
import numpy as np

import jax
import jax.numpy as jnp
from jax.experimental import pallas as pl
from jax.experimental.pallas import tpu as pltpu


# ----------------------------------------------------------------------------
# Pallas kernel: full MFN recurrence, single invocation, single packed input.
# ----------------------------------------------------------------------------
def mfn_kernel(T, N, N_pad, total_h, mem_dim, offs, slab_ref, out_ref):
    def blk(name):
        o, r, c = offs[name]
        return slab_ref[pl.ds(o, r), pl.ds(0, c)]

    def mm(a, b):
        return jnp.dot(a, b, preferred_element_type=jnp.float32)

    # ---- one-time weight / input loads (all static slices of the slab) ----
    x_all = blk("x")                     # (T*N_pad, d_in_total)
    wih = blk("wih")                     # (d_in_total, 4*total_h)
    whh = blk("whh")                     # (total_h, 4*total_h)
    b_g = blk("b")                       # (1, 4*total_h)
    a1w1 = blk("a1w1"); a1b1 = blk("a1b1")
    a1w2 = blk("a1w2"); a1b2 = blk("a1b2")
    w1f = blk("w1f"); b1f = blk("b1f")   # fused a2|g1|g2 first layer
    w2f = blk("w2f"); b2f = blk("b2f")   # fused a2|g1|g2 second layer (block-diag)
    ow1 = blk("ow1"); ob1 = blk("ob1")
    ow2 = blk("ow2"); ob2 = blk("ob2")   # lane-padded to 128 cols

    # ---- hoisted input-to-hidden projection for all timesteps ----
    gates_x = mm(x_all, wih) + b_g       # (T*N_pad, 4*total_h)

    # ---- recurrent state lives in vregs ----
    h = jnp.zeros((N, total_h), jnp.float32)
    c = blk("c0")                        # (N, total_h)
    mem = blk("mem0")                    # (N, mem_dim)

    for t in range(T):                   # static full unroll (T is small)
        prev_c = c

        # fused LSTM cell: one hidden matmul, gate order [i|f|o|g]
        gates = gates_x[t * N_pad:t * N_pad + N, :] + mm(h, whh)
        sig = jax.nn.sigmoid(gates[:, :3 * total_h])
        g_g = jnp.tanh(gates[:, 3 * total_h:])
        i_g = sig[:, :total_h]
        f_g = sig[:, total_h:2 * total_h]
        o_g = sig[:, 2 * total_h:]
        c = f_g * prev_c + i_g * g_g
        h = o_g * jnp.tanh(c)

        # attention over cStar (softmax along feature axis), exact divide
        cStar = jnp.concatenate([prev_c, c], axis=1)          # (N, 2*total_h)
        logits = mm(jax.nn.relu(mm(cStar, a1w1) + a1b1), a1w2) + a1b2
        e = jnp.exp(logits - jnp.max(logits, axis=1, keepdims=True))
        attention = e / jnp.sum(e, axis=1, keepdims=True)
        attended = attention * cStar

        # fused a2 / gamma1 / gamma2 MLPs
        both = jnp.concatenate([attended, mem], axis=1)        # (N, 2*total_h+mem)
        hid = jax.nn.relu(mm(both, w1f) + b1f)                 # (N, h2+hg1+hg2)
        o2 = mm(hid, w2f) + b2f                                # (N, 3*mem_dim)
        cHat = jnp.tanh(o2[:, :mem_dim])
        gam = jax.nn.sigmoid(o2[:, mem_dim:])
        mem = gam[:, :mem_dim] * mem + gam[:, mem_dim:] * cHat

    # ---- output MLP on final state (ow1 split by rows: no lane concat) ----
    hid_o = jax.nn.relu(mm(h, ow1[:total_h, :]) + mm(mem, ow1[total_h:, :]) + ob1)
    out_ref[...] = mm(hid_o, ow2) + ob2                        # (N, 128), lane-dense


# ----------------------------------------------------------------------------
# Host-side packing helpers (pure layout plumbing, identical math).
# ----------------------------------------------------------------------------
def _pack_lstm(wihs, whhs, bs, d_ins, dhs):
    """Block-diagonal fused LSTM weights, gate columns reordered to [i|f|o|g]."""
    total_h = sum(dhs)
    d_in_total = sum(d_ins)
    wih_f = jnp.zeros((d_in_total, 4 * total_h), jnp.float32)
    whh_f = jnp.zeros((total_h, 4 * total_h), jnp.float32)
    b_f = jnp.zeros((1, 4 * total_h), jnp.float32)
    gate_map = (0, 1, 3, 2)  # source order i,f,g,o -> fused block index
    x_off = 0
    h_off = 0
    for m in range(3):
        d_in, dh = d_ins[m], dhs[m]
        for old_g in range(4):
            col = gate_map[old_g] * total_h + h_off
            src = slice(old_g * dh, (old_g + 1) * dh)
            wih_f = wih_f.at[x_off:x_off + d_in, col:col + dh].set(wihs[m][:, src])
            whh_f = whh_f.at[h_off:h_off + dh, col:col + dh].set(whhs[m][:, src])
            b_f = b_f.at[:, col:col + dh].set(bs[m][:, src])
        x_off += d_in
        h_off += dh
    return wih_f, whh_f, b_f


def _build_slab(named_arrays, lanes=128):
    """Pack 2D f32 arrays into one (R, lanes) slab; blocks start at 8-aligned rows."""
    offs = {}
    blocks = []
    row = 0
    for name, a in named_arrays:
        a = jnp.asarray(a, jnp.float32)
        r, c = a.shape
        assert c <= lanes, (name, a.shape)
        offs[name] = (row, r, c)
        if c < lanes:
            a = jnp.concatenate([a, jnp.zeros((r, lanes - c), jnp.float32)], axis=1)
        blocks.append(a)
        row += r
        aligned = -(-row // 8) * 8
        if aligned > row:
            blocks.append(jnp.zeros((aligned - row, lanes), jnp.float32))
            row = aligned
    return jnp.concatenate(blocks, axis=0), offs


# ----------------------------------------------------------------------------
# Wrapper: weight repacking + single-DMA pallas_call.
# ----------------------------------------------------------------------------
def mfn_forward(x_l, x_a, x_v, c_l0, c_a0, c_v0, mem0, params):
    T, N, _ = x_l.shape
    dh_l, dh_a, dh_v = c_l0.shape[1], c_a0.shape[1], c_v0.shape[1]
    mem_dim = mem0.shape[1]
    total_h = dh_l + dh_a + dh_v

    (wih_l, whh_l, b_l, wih_a, whh_a, b_a, wih_v, whh_v, b_v,
     a1w1, a1b1, a1w2, a1b2, a2w1, a2b1, a2w2, a2b2,
     g1w1, g1b1, g1w2, g1b2, g2w1, g2b1, g2w2, g2b2,
     ow1, ob1, ow2, ob2) = params

    d_ins = (x_l.shape[2], x_a.shape[2], x_v.shape[2])
    dhs = (dh_l, dh_a, dh_v)

    # fused LSTM weights
    wih_f, whh_f, b_f = _pack_lstm((wih_l, wih_a, wih_v),
                                   (whh_l, whh_a, whh_v),
                                   (b_l, b_a, b_v), d_ins, dhs)

    # fused a2 / gamma1 / gamma2 MLPs
    h_att2, h_g1, h_g2 = a2w1.shape[1], g1w1.shape[1], g2w1.shape[1]
    attIn = 2 * total_h
    gammaIn = attIn + mem_dim
    w1f = jnp.zeros((gammaIn, h_att2 + h_g1 + h_g2), jnp.float32)
    w1f = w1f.at[:attIn, :h_att2].set(a2w1)           # a2 ignores mem rows (zeros)
    w1f = w1f.at[:, h_att2:h_att2 + h_g1].set(g1w1)
    w1f = w1f.at[:, h_att2 + h_g1:].set(g2w1)
    b1f = jnp.concatenate([a2b1, g1b1, g2b1], axis=1)
    w2f = jnp.zeros((h_att2 + h_g1 + h_g2, 3 * mem_dim), jnp.float32)
    w2f = w2f.at[:h_att2, :mem_dim].set(a2w2)
    w2f = w2f.at[h_att2:h_att2 + h_g1, mem_dim:2 * mem_dim].set(g1w2)
    w2f = w2f.at[h_att2 + h_g1:, 2 * mem_dim:].set(g2w2)
    b2f = jnp.concatenate([a2b2, g1b2, g2b2], axis=1)

    # lane-padded output head
    OUT_PAD = 128
    h_out = ow2.shape[0]
    ow2_p = jnp.zeros((h_out, OUT_PAD), jnp.float32).at[:, :ow2.shape[1]].set(ow2)
    ob2_p = jnp.zeros((1, OUT_PAD), jnp.float32).at[:, :ob2.shape[1]].set(ob2)

    # input sequence: concat modalities, pad batch rows to a multiple of 8 per step
    N_pad = -(-N // 8) * 8
    x_cat = jnp.concatenate([x_l, x_a, x_v], axis=-1)          # (T, N, d_in_total)
    x_pad = jnp.zeros((T, N_pad, x_cat.shape[-1]), jnp.float32).at[:, :N].set(x_cat)
    x_flat = x_pad.reshape(T * N_pad, x_cat.shape[-1])

    c0 = jnp.concatenate([c_l0, c_a0, c_v0], axis=1)           # (N, total_h)

    named = [
        ("x", x_flat), ("c0", c0), ("mem0", mem0),
        ("wih", wih_f), ("whh", whh_f), ("b", b_f),
        ("a1w1", a1w1), ("a1b1", a1b1), ("a1w2", a1w2), ("a1b2", a1b2),
        ("w1f", w1f), ("b1f", b1f), ("w2f", w2f), ("b2f", b2f),
        ("ow1", ow1), ("ob1", ob1), ("ow2", ow2_p), ("ob2", ob2_p),
    ]
    slab, offs = _build_slab(named)

    kernel = functools.partial(mfn_kernel, T, N, N_pad, total_h, mem_dim, offs)
    vmem = pl.BlockSpec(memory_space=pltpu.MemorySpace.VMEM)

    out = pl.pallas_call(
        kernel,
        out_shape=jax.ShapeDtypeStruct((N, OUT_PAD), jnp.float32),
        in_specs=[vmem],
        out_specs=vmem,
    )(slab)
    return out[:, :1]


# ----------------------------------------------------------------------------
# Pure-JAX reference (mirrors the PyTorch forward exactly; packed-gate weights).
# ----------------------------------------------------------------------------
def mfn_reference(x_l, x_a, x_v, c_l0, c_a0, c_v0, mem0, params):
    (wih_l, whh_l, b_l, wih_a, whh_a, b_a, wih_v, whh_v, b_v,
     a1w1, a1b1, a1w2, a1b2, a2w1, a2b1, a2w2, a2b2,
     g1w1, g1b1, g1w2, g1b2, g2w1, g2b1, g2w2, g2b2,
     ow1, ob1, ow2, ob2) = params

    def lstm(x, h, c, wih, whh, b):
        dh = h.shape[1]
        gates = x @ wih + h @ whh + b
        i = jax.nn.sigmoid(gates[:, :dh])
        f = jax.nn.sigmoid(gates[:, dh:2 * dh])
        g = jnp.tanh(gates[:, 2 * dh:3 * dh])
        o = jax.nn.sigmoid(gates[:, 3 * dh:])
        c_new = f * c + i * g
        return o * jnp.tanh(c_new), c_new

    T, _, _ = x_l.shape
    h_l = jnp.zeros_like(c_l0); h_a = jnp.zeros_like(c_a0); h_v = jnp.zeros_like(c_v0)
    c_l, c_a, c_v, mem = c_l0, c_a0, c_v0, mem0

    for t in range(T):
        prev_c_l, prev_c_a, prev_c_v = c_l, c_a, c_v
        h_l, c_l = lstm(x_l[t], h_l, prev_c_l, wih_l, whh_l, b_l)
        h_a, c_a = lstm(x_a[t], h_a, prev_c_a, wih_a, whh_a, b_a)
        h_v, c_v = lstm(x_v[t], h_v, prev_c_v, wih_v, whh_v, b_v)

        cStar = jnp.concatenate([prev_c_l, prev_c_a, prev_c_v, c_l, c_a, c_v], axis=1)
        attention = jax.nn.softmax(jax.nn.relu(cStar @ a1w1 + a1b1) @ a1w2 + a1b2, axis=1)
        attended = attention * cStar
        cHat = jnp.tanh(jax.nn.relu(attended @ a2w1 + a2b1) @ a2w2 + a2b2)
        both = jnp.concatenate([attended, mem], axis=1)
        gamma1 = jax.nn.sigmoid(jax.nn.relu(both @ g1w1 + g1b1) @ g1w2 + g1b2)
        gamma2 = jax.nn.sigmoid(jax.nn.relu(both @ g2w1 + g2b1) @ g2w2 + g2b2)
        mem = gamma1 * mem + gamma2 * cHat

    last_hs = jnp.concatenate([h_l, h_a, h_v, mem], axis=1)
    return jax.nn.relu(last_hs @ ow1 + ob1) @ ow2 + ob2


# ----------------------------------------------------------------------------
# Deterministic parameter init (shapes from MFN.__init__, gates packed i,f,g,o).
# ----------------------------------------------------------------------------
def init_lstm(key, d_in, dh, scale=0.2):
    k1, k2, k3 = jax.random.split(key, 3)
    wih = jax.random.uniform(k1, (d_in, 4 * dh), jnp.float32, -scale, scale)
    whh = jax.random.uniform(k2, (dh, 4 * dh), jnp.float32, -scale, scale)
    b = jax.random.uniform(k3, (1, 4 * dh), jnp.float32, -scale, scale)
    return wih, whh, b


def init_linear(key, d_in, d_out, scale=0.2):
    k1, k2 = jax.random.split(key)
    w = jax.random.uniform(k1, (d_in, d_out), jnp.float32, -scale, scale)
    b = jax.random.uniform(k2, (1, d_out), jnp.float32, -scale, scale)
    return w, b


if __name__ == "__main__":
    # ---- config (small, consistent with mfn_configs) ----
    T, N = 6, 4                      # sequence length, batch
    d_l_orig, d_a, d_v = 1, 5, 4     # input_dims (raw); d_l_embedded below
    d_l_embedded = 12
    vocab_size = 32
    dh_l, dh_a, dh_v = 8, 6, 6       # h_dims
    mem_dim = 8                      # memsize
    window_dim = 2                   # windowsize
    total_h = dh_l + dh_a + dh_v
    attIn = total_h * window_dim
    gammaIn = attIn + mem_dim
    final_out = total_h + mem_dim
    h_att1 = h_att2 = h_g1 = h_g2 = h_out = 16

    key = jax.random.PRNGKey(0)
    keys = jax.random.split(key, 20)

    # word-embedding table (Word_Embedding.embed)
    emb_table = jax.random.normal(keys[0], (vocab_size, d_l_embedded), jnp.float32)

    # inputs: x = [word index | audio feats | video feats], time-major (T, N, D)
    idx = jax.random.randint(keys[1], (T, N, d_l_orig), 0, vocab_size).astype(jnp.float32)
    feats = jax.random.normal(keys[2], (T, N, d_a + d_v), jnp.float32)
    x = jnp.concatenate([idx, feats], axis=-1)           # (T, N, d_l_orig + d_a + d_v)

    c_l_prior = 0.1 * jax.random.normal(keys[3], (N, dh_l), jnp.float32)
    c_a_prior = 0.1 * jax.random.normal(keys[4], (N, dh_a), jnp.float32)
    c_v_prior = 0.1 * jax.random.normal(keys[5], (N, dh_v), jnp.float32)
    c_mem_prior = 0.1 * jax.random.normal(keys[6], (N, mem_dim), jnp.float32)

    # parameters
    wih_l, whh_l, b_l = init_lstm(keys[7], d_l_embedded, dh_l)
    wih_a, whh_a, b_a = init_lstm(keys[8], d_a, dh_a)
    wih_v, whh_v, b_v = init_lstm(keys[9], d_v, dh_v)
    a1w1, a1b1 = init_linear(keys[10], attIn, h_att1)
    a1w2, a1b2 = init_linear(keys[11], h_att1, attIn)
    a2w1, a2b1 = init_linear(keys[12], attIn, h_att2)
    a2w2, a2b2 = init_linear(keys[13], h_att2, mem_dim)
    g1w1, g1b1 = init_linear(keys[14], gammaIn, h_g1)
    g1w2, g1b2 = init_linear(keys[15], h_g1, mem_dim)
    g2w1, g2b1 = init_linear(keys[16], gammaIn, h_g2)
    g2w2, g2b2 = init_linear(keys[17], h_g2, mem_dim)
    ow1, ob1 = init_linear(keys[18], final_out, h_out)
    ow2, ob2 = init_linear(keys[19], h_out, 1)

    params = (wih_l, whh_l, b_l, wih_a, whh_a, b_a, wih_v, whh_v, b_v,
              a1w1, a1b1, a1w2, a1b2, a2w1, a2b1, a2w2, a2b2,
              g1w1, g1b1, g1w2, g1b2, g2w1, g2b1, g2w2, g2b2,
              ow1, ob1, ow2, ob2)

    # glue (plain JAX): embedding gather + modality split, as in the PyTorch forward
    x_l = emb_table[x[:, :, 0].astype(jnp.int32)]         # (T, N, d_l_embedded)
    x_a = x[:, :, d_l_orig:d_l_orig + d_a]                # (T, N, d_a)
    x_v = x[:, :, d_l_orig + d_a:]                        # (T, N, d_v)

    out = mfn_forward(x_l, x_a, x_v, c_l_prior, c_a_prior, c_v_prior, c_mem_prior, params)
    out = jax.block_until_ready(out)

    ref = mfn_reference(x_l, x_a, x_v, c_l_prior, c_a_prior, c_v_prior, c_mem_prior, params)
    ref = jax.block_until_ready(ref)

    assert out.shape == (N, 1)
    np.testing.assert_allclose(np.asarray(out), np.asarray(ref), rtol=1e-4, atol=1e-4)
    print("KERNEL_OK")
</pallas_src>

<mosaic_0001>
module attributes {stable_mosaic.version = 11 : i64} {
  func.func @mfn_kernel(%arg0: memref<368x128xf32, #tpu.memory_space<vmem>>, %arg1: memref<4x128xf32, #tpu.memory_space<vmem>>) attributes {dimension_semantics = [], scalar_prefetch = 0 : i64, scratch_operands = 0 : i64, tpu.core_type = #tpu.core_type<tc>} {
    %c0 = arith.constant 0 : index
    %c0_0 = arith.constant 0 : index
    %0 = vector.load %arg0[%c0, %c0_0] : memref<368x128xf32, #tpu.memory_space<vmem>>, vector<48x21xf32>
    %c64 = arith.constant 64 : index
    %c0_1 = arith.constant 0 : index
    %1 = vector.load %arg0[%c64, %c0_1] : memref<368x128xf32, #tpu.memory_space<vmem>>, vector<21x80xf32>
    %c88 = arith.constant 88 : index
    %c0_2 = arith.constant 0 : index
    %2 = vector.load %arg0[%c88, %c0_2] : memref<368x128xf32, #tpu.memory_space<vmem>>, vector<20x80xf32>
    %c112 = arith.constant 112 : index
    %c0_3 = arith.constant 0 : index
    %3 = vector.load %arg0[%c112, %c0_3] : memref<368x128xf32, #tpu.memory_space<vmem>>, vector<1x80xf32>
    %c120 = arith.constant 120 : index
    %c0_4 = arith.constant 0 : index
    %4 = vector.load %arg0[%c120, %c0_4] : memref<368x128xf32, #tpu.memory_space<vmem>>, vector<40x16xf32>
    %c160 = arith.constant 160 : index
    %c0_5 = arith.constant 0 : index
    %5 = vector.load %arg0[%c160, %c0_5] : memref<368x128xf32, #tpu.memory_space<vmem>>, vector<1x16xf32>
    %c168 = arith.constant 168 : index
    %c0_6 = arith.constant 0 : index
    %6 = vector.load %arg0[%c168, %c0_6] : memref<368x128xf32, #tpu.memory_space<vmem>>, vector<16x40xf32>
    %c184 = arith.constant 184 : index
    %c0_7 = arith.constant 0 : index
    %7 = vector.load %arg0[%c184, %c0_7] : memref<368x128xf32, #tpu.memory_space<vmem>>, vector<1x40xf32>
    %c192 = arith.constant 192 : index
    %c0_8 = arith.constant 0 : index
    %8 = vector.load %arg0[%c192, %c0_8] : memref<368x128xf32, #tpu.memory_space<vmem>>, vector<48x48xf32>
    %c240 = arith.constant 240 : index
    %c0_9 = arith.constant 0 : index
    %9 = vector.load %arg0[%c240, %c0_9] : memref<368x128xf32, #tpu.memory_space<vmem>>, vector<1x48xf32>
    %c248 = arith.constant 248 : index
    %c0_10 = arith.constant 0 : index
    %10 = vector.load %arg0[%c248, %c0_10] : memref<368x128xf32, #tpu.memory_space<vmem>>, vector<48x24xf32>
    %c296 = arith.constant 296 : index
    %c0_11 = arith.constant 0 : index
    %11 = vector.load %arg0[%c296, %c0_11] : memref<368x128xf32, #tpu.memory_space<vmem>>, vector<1x24xf32>
    %c304 = arith.constant 304 : index
    %c0_12 = arith.constant 0 : index
    %12 = vector.load %arg0[%c304, %c0_12] : memref<368x128xf32, #tpu.memory_space<vmem>>, vector<28x16xf32>
    %c336 = arith.constant 336 : index
    %c0_13 = arith.constant 0 : index
    %13 = vector.load %arg0[%c336, %c0_13] : memref<368x128xf32, #tpu.memory_space<vmem>>, vector<1x16xf32>
    %c344 = arith.constant 344 : index
    %c0_14 = arith.constant 0 : index
    %14 = vector.load %arg0[%c344, %c0_14] : memref<368x128xf32, #tpu.memory_space<vmem>>, vector<16x128xf32>
    %c360 = arith.constant 360 : index
    %c0_15 = arith.constant 0 : index
    %15 = vector.load %arg0[%c360, %c0_15] : memref<368x128xf32, #tpu.memory_space<vmem>>, vector<1x128xf32>
    %cst = arith.constant dense<0.000000e+00> : vector<48x80xf32>
    %16 = tpu.matmul %0, %1, %cst {dimension_numbers = #tpu.dot_dimension_numbers<[1], [0], [0], [1], [0, 0, 1, 1], [], []>} : vector<48x21xf32>, vector<21x80xf32>, vector<48x80xf32> -> vector<48x80xf32>
    %17 = vector.broadcast %3 : vector<1x80xf32> to vector<48x80xf32>
    %18 = arith.addf %16, %17 : vector<48x80xf32>
    %cst_16 = arith.constant 0.000000e+00 : f32
    %19 = vector.broadcast %cst_16 : f32 to vector<4x20xf32>
    %c48 = arith.constant 48 : index
    %c0_17 = arith.constant 0 : index
    %20 = vector.load %arg0[%c48, %c0_17] : memref<368x128xf32, #tpu.memory_space<vmem>>, vector<4x20xf32>
    %c56 = arith.constant 56 : index
    %c0_18 = arith.constant 0 : index
    %21 = vector.load %arg0[%c56, %c0_18] : memref<368x128xf32, #tpu.memory_space<vmem>>, vector<4x8xf32>
    %22 = vector.extract_strided_slice %18 {offsets = [0, 0], sizes = [4, 80], strides = [1, 1]} : vector<48x80xf32> to vector<4x80xf32>
    %cst_19 = arith.constant dense<0.000000e+00> : vector<4x80xf32>
    %23 = tpu.matmul %19, %2, %cst_19 {dimension_numbers = #tpu.dot_dimension_numbers<[1], [0], [0], [1], [0, 0, 1, 1], [], []>} : vector<4x20xf32>, vector<20x80xf32>, vector<4x80xf32> -> vector<4x80xf32>
    %24 = arith.addf %22, %23 : vector<4x80xf32>
    %25 = vector.extract_strided_slice %24 {offsets = [0, 0], sizes = [4, 60], strides = [1, 1]} : vector<4x80xf32> to vector<4x60xf32>
    %26 = arith.negf %25 : vector<4x60xf32>
    %27 = math.exp %26 : vector<4x60xf32>
    %cst_20 = arith.constant 1.000000e+00 : f32
    %28 = vector.broadcast %cst_20 : f32 to vector<4x60xf32>
    %29 = arith.addf %28, %27 : vector<4x60xf32>
    %30 = arith.divf %28, %29 : vector<4x60xf32>
    %31 = vector.extract_strided_slice %24 {offsets = [0, 60], sizes = [4, 20], strides = [1, 1]} : vector<4x80xf32> to vector<4x20xf32>
    %32 = math.tanh %31 : vector<4x20xf32>
    %33 = vector.extract_strided_slice %30 {offsets = [0, 0], sizes = [4, 20], strides = [1, 1]} : vector<4x60xf32> to vector<4x20xf32>
    %34 = vector.extract_strided_slice %30 {offsets = [0, 20], sizes = [4, 20], strides = [1, 1]} : vector<4x60xf32> to vector<4x20xf32>
    %35 = vector.extract_strided_slice %30 {offsets = [0, 40], sizes = [4, 20], strides = [1, 1]} : vector<4x60xf32> to vector<4x20xf32>
    %36 = arith.mulf %34, %20 : vector<4x20xf32>
    %37 = arith.mulf %33, %32 : vector<4x20xf32>
    %38 = arith.addf %36, %37 : vector<4x20xf32>
    %39 = math.tanh %38 : vector<4x20xf32>
    %40 = arith.mulf %35, %39 : vector<4x20xf32>
    %41 = tpu.concatenate %20, %38 in 1 : vector<4x20xf32>, vector<4x20xf32> -> vector<4x40xf32>
    %cst_21 = arith.constant dense<0.000000e+00> : vector<4x16xf32>
    %42 = tpu.matmul %41, %4, %cst_21 {dimension_numbers = #tpu.dot_dimension_numbers<[1], [0], [0], [1], [0, 0, 1, 1], [], []>} : vector<4x40xf32>, vector<40x16xf32>, vector<4x16xf32> -> vector<4x16xf32>
    %43 = vector.broadcast %5 : vector<1x16xf32> to vector<4x16xf32>
    %44 = arith.addf %42, %43 : vector<4x16xf32>
    %cst_22 = arith.constant 0.000000e+00 : f32
    %45 = vector.broadcast %cst_22 : f32 to vector<4x16xf32>
    %46 = arith.maximumf %44, %45 : vector<4x16xf32>
    %cst_23 = arith.constant dense<0.000000e+00> : vector<4x40xf32>
    %47 = tpu.matmul %46, %6, %cst_23 {dimension_numbers = #tpu.dot_dimension_numbers<[1], [0], [0], [1], [0, 0, 1, 1], [], []>} : vector<4x16xf32>, vector<16x40xf32>, vector<4x40xf32> -> vector<4x40xf32>
    %48 = vector.broadcast %7 : vector<1x40xf32> to vector<4x40xf32>
    %49 = arith.addf %47, %48 : vector<4x40xf32>
    %cst_24 = arith.constant dense<0xFF800000> : vector<4xf32>
    %50 = vector.multi_reduction <maximumf>, %49, %cst_24 [1] : vector<4x40xf32> to vector<4xf32>
    %51 = vector.shape_cast %50 : vector<4xf32> to vector<4x1xf32>
    %52 = vector.broadcast %51 : vector<4x1xf32> to vector<4x40xf32>
    %53 = arith.subf %49, %52 : vector<4x40xf32>
    %54 = math.exp %53 : vector<4x40xf32>
    %cst_25 = arith.constant dense<0.000000e+00> : vector<4xf32>
    %55 = vector.multi_reduction <add>, %54, %cst_25 [1] : vector<4x40xf32> to vector<4xf32>
    %56 = vector.shape_cast %55 : vector<4xf32> to vector<4x1xf32>
    %57 = vector.broadcast %56 : vector<4x1xf32> to vector<4x40xf32>
    %58 = arith.divf %54, %57 : vector<4x40xf32>
    %59 = arith.mulf %58, %41 : vector<4x40xf32>
    %60 = tpu.concatenate %59, %21 in 1 : vector<4x40xf32>, vector<4x8xf32> -> vector<4x48xf32>
    %cst_26 = arith.constant dense<0.000000e+00> : vector<4x48xf32>
    %61 = tpu.matmul %60, %8, %cst_26 {dimension_numbers = #tpu.dot_dimension_numbers<[1], [0], [0], [1], [0, 0, 1, 1], [], []>} : vector<4x48xf32>, vector<48x48xf32>, vector<4x48xf32> -> vector<4x48xf32>
    %62 = vector.broadcast %9 : vector<1x48xf32> to vector<4x48xf32>
    %63 = arith.addf %61, %62 : vector<4x48xf32>
    %cst_27 = arith.constant 0.000000e+00 : f32
    %64 = vector.broadcast %cst_27 : f32 to vector<4x48xf32>
    %65 = arith.maximumf %63, %64 : vector<4x48xf32>
    %cst_28 = arith.constant dense<0.000000e+00> : vector<4x24xf32>
    %66 = tpu.matmul %65, %10, %cst_28 {dimension_numbers = #tpu.dot_dimension_numbers<[1], [0], [0], [1], [0, 0, 1, 1], [], []>} : vector<4x48xf32>, vector<48x24xf32>, vector<4x24xf32> -> vector<4x24xf32>
    %67 = vector.broadcast %11 : vector<1x24xf32> to vector<4x24xf32>
    %68 = arith.addf %66, %67 : vector<4x24xf32>
    %69 = vector.extract_strided_slice %68 {offsets = [0, 0], sizes = [4, 8], strides = [1, 1]} : vector<4x24xf32> to vector<4x8xf32>
    %70 = math.tanh %69 : vector<4x8xf32>
    %71 = vector.extract_strided_slice %68 {offsets = [0, 8], sizes = [4, 16], strides = [1, 1]} : vector<4x24xf32> to vector<4x16xf32>
    %72 = arith.negf %71 : vector<4x16xf32>
    %73 = math.exp %72 : vector<4x16xf32>
    %cst_29 = arith.constant 1.000000e+00 : f32
    %74 = vector.broadcast %cst_29 : f32 to vector<4x16xf32>
    %75 = arith.addf %74, %73 : vector<4x16xf32>
    %76 = arith.divf %74, %75 : vector<4x16xf32>
    %77 = vector.extract_strided_slice %76 {offsets = [0, 0], sizes = [4, 8], strides = [1, 1]} : vector<4x16xf32> to vector<4x8xf32>
    %78 = arith.mulf %77, %21 : vector<4x8xf32>
    %79 = vector.extract_strided_slice %76 {offsets = [0, 8], sizes = [4, 8], strides = [1, 1]} : vector<4x16xf32> to vector<4x8xf32>
    %80 = arith.mulf %79, %70 : vector<4x8xf32>
    %81 = arith.addf %78, %80 : vector<4x8xf32>
    %82 = vector.extract_strided_slice %18 {offsets = [8, 0], sizes = [4, 80], strides = [1, 1]} : vector<48x80xf32> to vector<4x80xf32>
    %cst_30 = arith.constant dense<0.000000e+00> : vector<4x80xf32>
    %83 = tpu.matmul %40, %2, %cst_30 {dimension_numbers = #tpu.dot_dimension_numbers<[1], [0], [0], [1], [0, 0, 1, 1], [], []>} : vector<4x20xf32>, vector<20x80xf32>, vector<4x80xf32> -> vector<4x80xf32>
    %84 = arith.addf %82, %83 : vector<4x80xf32>
    %85 = vector.extract_strided_slice %84 {offsets = [0, 0], sizes = [4, 60], strides = [1, 1]} : vector<4x80xf32> to vector<4x60xf32>
    %86 = arith.negf %85 : vector<4x60xf32>
    %87 = math.exp %86 : vector<4x60xf32>
    %cst_31 = arith.constant 1.000000e+00 : f32
    %88 = vector.broadcast %cst_31 : f32 to vector<4x60xf32>
    %89 = arith.addf %88, %87 : vector<4x60xf32>
    %90 = arith.divf %88, %89 : vector<4x60xf32>
    %91 = vector.extract_strided_slice %84 {offsets = [0, 60], sizes = [4, 20], strides = [1, 1]} : vector<4x80xf32> to vector<4x20xf32>
    %92 = math.tanh %91 : vector<4x20xf32>
    %93 = vector.extract_strided_slice %90 {offsets = [0, 0], sizes = [4, 20], strides = [1, 1]} : vector<4x60xf32> to vector<4x20xf32>
    %94 = vector.extract_strided_slice %90 {offsets = [0, 20], sizes = [4, 20], strides = [1, 1]} : vector<4x60xf32> to vector<4x20xf32>
    %95 = vector.extract_strided_slice %90 {offsets = [0, 40], sizes = [4, 20], strides = [1, 1]} : vector<4x60xf32> to vector<4x20xf32>
    %96 = arith.mulf %94, %38 : vector<4x20xf32>
    %97 = arith.mulf %93, %92 : vector<4x20xf32>
    %98 = arith.addf %96, %97 : vector<4x20xf32>
    %99 = math.tanh %98 : vector<4x20xf32>
    %100 = arith.mulf %95, %99 : vector<4x20xf32>
    %101 = tpu.concatenate %38, %98 in 1 : vector<4x20xf32>, vector<4x20xf32> -> vector<4x40xf32>
    %cst_32 = arith.constant dense<0.000000e+00> : vector<4x16xf32>
    %102 = tpu.matmul %101, %4, %cst_32 {dimension_numbers = #tpu.dot_dimension_numbers<[1], [0], [0], [1], [0, 0, 1, 1], [], []>} : vector<4x40xf32>, vector<40x16xf32>, vector<4x16xf32> -> vector<4x16xf32>
    %103 = vector.broadcast %5 : vector<1x16xf32> to vector<4x16xf32>
    %104 = arith.addf %102, %103 : vector<4x16xf32>
    %cst_33 = arith.constant 0.000000e+00 : f32
    %105 = vector.broadcast %cst_33 : f32 to vector<4x16xf32>
    %106 = arith.maximumf %104, %105 : vector<4x16xf32>
    %cst_34 = arith.constant dense<0.000000e+00> : vector<4x40xf32>
    %107 = tpu.matmul %106, %6, %cst_34 {dimension_numbers = #tpu.dot_dimension_numbers<[1], [0], [0], [1], [0, 0, 1, 1], [], []>} : vector<4x16xf32>, vector<16x40xf32>, vector<4x40xf32> -> vector<4x40xf32>
    %108 = vector.broadcast %7 : vector<1x40xf32> to vector<4x40xf32>
    %109 = arith.addf %107, %108 : vector<4x40xf32>
    %cst_35 = arith.constant dense<0xFF800000> : vector<4xf32>
    %110 = vector.multi_reduction <maximumf>, %109, %cst_35 [1] : vector<4x40xf32> to vector<4xf32>
    %111 = vector.shape_cast %110 : vector<4xf32> to vector<4x1xf32>
    %112 = vector.broadcast %111 : vector<4x1xf32> to vector<4x40xf32>
    %113 = arith.subf %109, %112 : vector<4x40xf32>
    %114 = math.exp %113 : vector<4x40xf32>
    %cst_36 = arith.constant dense<0.000000e+00> : vector<4xf32>
    %115 = vector.multi_reduction <add>, %114, %cst_36 [1] : vector<4x40xf32> to vector<4xf32>
    %116 = vector.shape_cast %115 : vector<4xf32> to vector<4x1xf32>
    %117 = vector.broadcast %116 : vector<4x1xf32> to vector<4x40xf32>
    %118 = arith.divf %114, %117 : vector<4x40xf32>
    %119 = arith.mulf %118, %101 : vector<4x40xf32>
    %120 = tpu.concatenate %119, %81 in 1 : vector<4x40xf32>, vector<4x8xf32> -> vector<4x48xf32>
    %cst_37 = arith.constant dense<0.000000e+00> : vector<4x48xf32>
    %121 = tpu.matmul %120, %8, %cst_37 {dimension_numbers = #tpu.dot_dimension_numbers<[1], [0], [0], [1], [0, 0, 1, 1], [], []>} : vector<4x48xf32>, vector<48x48xf32>, vector<4x48xf32> -> vector<4x48xf32>
    %122 = vector.broadcast %9 : vector<1x48xf32> to vector<4x48xf32>
    %123 = arith.addf %121, %122 : vector<4x48xf32>
    %cst_38 = arith.constant 0.000000e+00 : f32
    %124 = vector.broadcast %cst_38 : f32 to vector<4x48xf32>
    %125 = arith.maximumf %123, %124 : vector<4x48xf32>
    %cst_39 = arith.constant dense<0.000000e+00> : vector<4x24xf32>
    %126 = tpu.matmul %125, %10, %cst_39 {dimension_numbers = #tpu.dot_dimension_numbers<[1], [0], [0], [1], [0, 0, 1, 1], [], []>} : vector<4x48xf32>, vector<48x24xf32>, vector<4x24xf32> -> vector<4x24xf32>
    %127 = vector.broadcast %11 : vector<1x24xf32> to vector<4x24xf32>
    %128 = arith.addf %126, %127 : vector<4x24xf32>
    %129 = vector.extract_strided_slice %128 {offsets = [0, 0], sizes = [4, 8], strides = [1, 1]} : vector<4x24xf32> to vector<4x8xf32>
    %130 = math.tanh %129 : vector<4x8xf32>
    %131 = vector.extract_strided_slice %128 {offsets = [0, 8], sizes = [4, 16], strides = [1, 1]} : vector<4x24xf32> to vector<4x16xf32>
    %132 = arith.negf %131 : vector<4x16xf32>
    %133 = math.exp %132 : vector<4x16xf32>
    %cst_40 = arith.constant 1.000000e+00 : f32
    %134 = vector.broadcast %cst_40 : f32 to vector<4x16xf32>
    %135 = arith.addf %134, %133 : vector<4x16xf32>
    %136 = arith.divf %134, %135 : vector<4x16xf32>
    %137 = vector.extract_strided_slice %136 {offsets = [0, 0], sizes = [4, 8], strides = [1, 1]} : vector<4x16xf32> to vector<4x8xf32>
    %138 = arith.mulf %137, %81 : vector<4x8xf32>
    %139 = vector.extract_strided_slice %136 {offsets = [0, 8], sizes = [4, 8], strides = [1, 1]} : vector<4x16xf32> to vector<4x8xf32>
    %140 = arith.mulf %139, %130 : vector<4x8xf32>
    %141 = arith.addf %138, %140 : vector<4x8xf32>
    %142 = vector.extract_strided_slice %18 {offsets = [16, 0], sizes = [4, 80], strides = [1, 1]} : vector<48x80xf32> to vector<4x80xf32>
    %cst_41 = arith.constant dense<0.000000e+00> : vector<4x80xf32>
    %143 = tpu.matmul %100, %2, %cst_41 {dimension_numbers = #tpu.dot_dimension_numbers<[1], [0], [0], [1], [0, 0, 1, 1], [], []>} : vector<4x20xf32>, vector<20x80xf32>, vector<4x80xf32> -> vector<4x80xf32>
    %144 = arith.addf %142, %143 : vector<4x80xf32>
    %145 = vector.extract_strided_slice %144 {offsets = [0, 0], sizes = [4, 60], strides = [1, 1]} : vector<4x80xf32> to vector<4x60xf32>
    %146 = arith.negf %145 : vector<4x60xf32>
    %147 = math.exp %146 : vector<4x60xf32>
    %cst_42 = arith.constant 1.000000e+00 : f32
    %148 = vector.broadcast %cst_42 : f32 to vector<4x60xf32>
    %149 = arith.addf %148, %147 : vector<4x60xf32>
    %150 = arith.divf %148, %149 : vector<4x60xf32>
    %151 = vector.extract_strided_slice %144 {offsets = [0, 60], sizes = [4, 20], strides = [1, 1]} : vector<4x80xf32> to vector<4x20xf32>
    %152 = math.tanh %151 : vector<4x20xf32>
    %153 = vector.extract_strided_slice %150 {offsets = [0, 0], sizes = [4, 20], strides = [1, 1]} : vector<4x60xf32> to vector<4x20xf32>
    %154 = vector.extract_strided_slice %150 {offsets = [0, 20], sizes = [4, 20], strides = [1, 1]} : vector<4x60xf32> to vector<4x20xf32>
    %155 = vector.extract_strided_slice %150 {offsets = [0, 40], sizes = [4, 20], strides = [1, 1]} : vector<4x60xf32> to vector<4x20xf32>
    %156 = arith.mulf %154, %98 : vector<4x20xf32>
    %157 = arith.mulf %153, %152 : vector<4x20xf32>
    %158 = arith.addf %156, %157 : vector<4x20xf32>
    %159 = math.tanh %158 : vector<4x20xf32>
    %160 = arith.mulf %155, %159 : vector<4x20xf32>
    %161 = tpu.concatenate %98, %158 in 1 : vector<4x20xf32>, vector<4x20xf32> -> vector<4x40xf32>
    %cst_43 = arith.constant dense<0.000000e+00> : vector<4x16xf32>
    %162 = tpu.matmul %161, %4, %cst_43 {dimension_numbers = #tpu.dot_dimension_numbers<[1], [0], [0], [1], [0, 0, 1, 1], [], []>} : vector<4x40xf32>, vector<40x16xf32>, vector<4x16xf32> -> vector<4x16xf32>
    %163 = vector.broadcast %5 : vector<1x16xf32> to vector<4x16xf32>
    %164 = arith.addf %162, %163 : vector<4x16xf32>
    %cst_44 = arith.constant 0.000000e+00 : f32
    %165 = vector.broadcast %cst_44 : f32 to vector<4x16xf32>
    %166 = arith.maximumf %164, %165 : vector<4x16xf32>
    %cst_45 = arith.constant dense<0.000000e+00> : vector<4x40xf32>
    %167 = tpu.matmul %166, %6, %cst_45 {dimension_numbers = #tpu.dot_dimension_numbers<[1], [0], [0], [1], [0, 0, 1, 1], [], []>} : vector<4x16xf32>, vector<16x40xf32>, vector<4x40xf32> -> vector<4x40xf32>
    %168 = vector.broadcast %7 : vector<1x40xf32> to vector<4x40xf32>
    %169 = arith.addf %167, %168 : vector<4x40xf32>
    %cst_46 = arith.constant dense<0xFF800000> : vector<4xf32>
    %170 = vector.multi_reduction <maximumf>, %169, %cst_46 [1] : vector<4x40xf32> to vector<4xf32>
    %171 = vector.shape_cast %170 : vector<4xf32> to vector<4x1xf32>
    %172 = vector.broadcast %171 : vector<4x1xf32> to vector<4x40xf32>
    %173 = arith.subf %169, %172 : vector<4x40xf32>
    %174 = math.exp %173 : vector<4x40xf32>
    %cst_47 = arith.constant dense<0.000000e+00> : vector<4xf32>
    %175 = vector.multi_reduction <add>, %174, %cst_47 [1] : vector<4x40xf32> to vector<4xf32>
    %176 = vector.shape_cast %175 : vector<4xf32> to vector<4x1xf32>
    %177 = vector.broadcast %176 : vector<4x1xf32> to vector<4x40xf32>
    %178 = arith.divf %174, %177 : vector<4x40xf32>
    %179 = arith.mulf %178, %161 : vector<4x40xf32>
    %180 = tpu.concatenate %179, %141 in 1 : vector<4x40xf32>, vector<4x8xf32> -> vector<4x48xf32>
    %cst_48 = arith.constant dense<0.000000e+00> : vector<4x48xf32>
    %181 = tpu.matmul %180, %8, %cst_48 {dimension_numbers = #tpu.dot_dimension_numbers<[1], [0], [0], [1], [0, 0, 1, 1], [], []>} : vector<4x48xf32>, vector<48x48xf32>, vector<4x48xf32> -> vector<4x48xf32>
    %182 = vector.broadcast %9 : vector<1x48xf32> to vector<4x48xf32>
    %183 = arith.addf %181, %182 : vector<4x48xf32>
    %cst_49 = arith.constant 0.000000e+00 : f32
    %184 = vector.broadcast %cst_49 : f32 to vector<4x48xf32>
    %185 = arith.maximumf %183, %184 : vector<4x48xf32>
    %cst_50 = arith.constant dense<0.000000e+00> : vector<4x24xf32>
    %186 = tpu.matmul %185, %10, %cst_50 {dimension_numbers = #tpu.dot_dimension_numbers<[1], [0], [0], [1], [0, 0, 1, 1], [], []>} : vector<4x48xf32>, vector<48x24xf32>, vector<4x24xf32> -> vector<4x24xf32>
    %187 = vector.broadcast %11 : vector<1x24xf32> to vector<4x24xf32>
    %188 = arith.addf %186, %187 : vector<4x24xf32>
    %189 = vector.extract_strided_slice %188 {offsets = [0, 0], sizes = [4, 8], strides = [1, 1]} : vector<4x24xf32> to vector<4x8xf32>
    %190 = math.tanh %189 : vector<4x8xf32>
    %191 = vector.extract_strided_slice %188 {offsets = [0, 8], sizes = [4, 16], strides = [1, 1]} : vector<4x24xf32> to vector<4x16xf32>
    %192 = arith.negf %191 : vector<4x16xf32>
    %193 = math.exp %192 : vector<4x16xf32>
    %cst_51 = arith.constant 1.000000e+00 : f32
    %194 = vector.broadcast %cst_51 : f32 to vector<4x16xf32>
    %195 = arith.addf %194, %193 : vector<4x16xf32>
    %196 = arith.divf %194, %195 : vector<4x16xf32>
    %197 = vector.extract_strided_slice %196 {offsets = [0, 0], sizes = [4, 8], strides = [1, 1]} : vector<4x16xf32> to vector<4x8xf32>
    %198 = arith.mulf %197, %141 : vector<4x8xf32>
    %199 = vector.extract_strided_slice %196 {offsets = [0, 8], sizes = [4, 8], strides = [1, 1]} : vector<4x16xf32> to vector<4x8xf32>
    %200 = arith.mulf %199, %190 : vector<4x8xf32>
    %201 = arith.addf %198, %200 : vector<4x8xf32>
    %202 = vector.extract_strided_slice %18 {offsets = [24, 0], sizes = [4, 80], strides = [1, 1]} : vector<48x80xf32> to vector<4x80xf32>
    %cst_52 = arith.constant dense<0.000000e+00> : vector<4x80xf32>
    %203 = tpu.matmul %160, %2, %cst_52 {dimension_numbers = #tpu.dot_dimension_numbers<[1], [0], [0], [1], [0, 0, 1, 1], [], []>} : vector<4x20xf32>, vector<20x80xf32>, vector<4x80xf32> -> vector<4x80xf32>
    %204 = arith.addf %202, %203 : vector<4x80xf32>
    %205 = vector.extract_strided_slice %204 {offsets = [0, 0], sizes = [4, 60], strides = [1, 1]} : vector<4x80xf32> to vector<4x60xf32>
    %206 = arith.negf %205 : vector<4x60xf32>
    %207 = math.exp %206 : vector<4x60xf32>
    %cst_53 = arith.constant 1.000000e+00 : f32
    %208 = vector.broadcast %cst_53 : f32 to vector<4x60xf32>
    %209 = arith.addf %208, %207 : vector<4x60xf32>
    %210 = arith.divf %208, %209 : vector<4x60xf32>
    %211 = vector.extract_strided_slice %204 {offsets = [0, 60], sizes = [4, 20], strides = [1, 1]} : vector<4x80xf32> to vector<4x20xf32>
    %212 = math.tanh %211 : vector<4x20xf32>
    %213 = vector.extract_strided_slice %210 {offsets = [0, 0], sizes = [4, 20], strides = [1, 1]} : vector<4x60xf32> to vector<4x20xf32>
    %214 = vector.extract_strided_slice %210 {offsets = [0, 20], sizes = [4, 20], strides = [1, 1]} : vector<4x60xf32> to vector<4x20xf32>
    %215 = vector.extract_strided_slice %210 {offsets = [0, 40], sizes = [4, 20], strides = [1, 1]} : vector<4x60xf32> to vector<4x20xf32>
    %216 = arith.mulf %214, %158 : vector<4x20xf32>
    %217 = arith.mulf %213, %212 : vector<4x20xf32>
    %218 = arith.addf %216, %217 : vector<4x20xf32>
    %219 = math.tanh %218 : vector<4x20xf32>
    %220 = arith.mulf %215, %219 : vector<4x20xf32>
    %221 = tpu.concatenate %158, %218 in 1 : vector<4x20xf32>, vector<4x20xf32> -> vector<4x40xf32>
    %cst_54 = arith.constant dense<0.000000e+00> : vector<4x16xf32>
    %222 = tpu.matmul %221, %4, %cst_54 {dimension_numbers = #tpu.dot_dimension_numbers<[1], [0], [0], [1], [0, 0, 1, 1], [], []>} : vector<4x40xf32>, vector<40x16xf32>, vector<4x16xf32> -> vector<4x16xf32>
    %223 = vector.broadcast %5 : vector<1x16xf32> to vector<4x16xf32>
    %224 = arith.addf %222, %223 : vector<4x16xf32>
    %cst_55 = arith.constant 0.000000e+00 : f32
    %225 = vector.broadcast %cst_55 : f32 to vector<4x16xf32>
    %226 = arith.maximumf %224, %225 : vector<4x16xf32>
    %cst_56 = arith.constant dense<0.000000e+00> : vector<4x40xf32>
    %227 = tpu.matmul %226, %6, %cst_56 {dimension_numbers = #tpu.dot_dimension_numbers<[1], [0], [0], [1], [0, 0, 1, 1], [], []>} : vector<4x16xf32>, vector<16x40xf32>, vector<4x40xf32> -> vector<4x40xf32>
    %228 = vector.broadcast %7 : vector<1x40xf32> to vector<4x40xf32>
    %229 = arith.addf %227, %228 : vector<4x40xf32>
    %cst_57 = arith.constant dense<0xFF800000> : vector<4xf32>
    %230 = vector.multi_reduction <maximumf>, %229, %cst_57 [1] : vector<4x40xf32> to vector<4xf32>
    %231 = vector.shape_cast %230 : vector<4xf32> to vector<4x1xf32>
    %232 = vector.broadcast %231 : vector<4x1xf32> to vector<4x40xf32>
    %233 = arith.subf %229, %232 : vector<4x40xf32>
    %234 = math.exp %233 : vector<4x40xf32>
    %cst_58 = arith.constant dense<0.000000e+00> : vector<4xf32>
    %235 = vector.multi_reduction <add>, %234, %cst_58 [1] : vector<4x40xf32> to vector<4xf32>
    %236 = vector.shape_cast %235 : vector<4xf32> to vector<4x1xf32>
    %237 = vector.broadcast %236 : vector<4x1xf32> to vector<4x40xf32>
    %238 = arith.divf %234, %237 : vector<4x40xf32>
    %239 = arith.mulf %238, %221 : vector<4x40xf32>
    %240 = tpu.concatenate %239, %201 in 1 : vector<4x40xf32>, vector<4x8xf32> -> vector<4x48xf32>
    %cst_59 = arith.constant dense<0.000000e+00> : vector<4x48xf32>
    %241 = tpu.matmul %240, %8, %cst_59 {dimension_numbers = #tpu.dot_dimension_numbers<[1], [0], [0], [1], [0, 0, 1, 1], [], []>} : vector<4x48xf32>, vector<48x48xf32>, vector<4x48xf32> -> vector<4x48xf32>
    %242 = vector.broadcast %9 : vector<1x48xf32> to vector<4x48xf32>
    %243 = arith.addf %241, %242 : vector<4x48xf32>
    %cst_60 = arith.constant 0.000000e+00 : f32
    %244 = vector.broadcast %cst_60 : f32 to vector<4x48xf32>
    %245 = arith.maximumf %243, %244 : vector<4x48xf32>
    %cst_61 = arith.constant dense<0.000000e+00> : vector<4x24xf32>
    %246 = tpu.matmul %245, %10, %cst_61 {dimension_numbers = #tpu.dot_dimension_numbers<[1], [0], [0], [1], [0, 0, 1, 1], [], []>} : vector<4x48xf32>, vector<48x24xf32>, vector<4x24xf32> -> vector<4x24xf32>
    %247 = vector.broadcast %11 : vector<1x24xf32> to vector<4x24xf32>
    %248 = arith.addf %246, %247 : vector<4x24xf32>
    %249 = vector.extract_strided_slice %248 {offsets = [0, 0], sizes = [4, 8], strides = [1, 1]} : vector<4x24xf32> to vector<4x8xf32>
    %250 = math.tanh %249 : vector<4x8xf32>
    %251 = vector.extract_strided_slice %248 {offsets = [0, 8], sizes = [4, 16], strides = [1, 1]} : vector<4x24xf32> to vector<4x16xf32>
    %252 = arith.negf %251 : vector<4x16xf32>
    %253 = math.exp %252 : vector<4x16xf32>
    %cst_62 = arith.constant 1.000000e+00 : f32
    %254 = vector.broadcast %cst_62 : f32 to vector<4x16xf32>
    %255 = arith.addf %254, %253 : vector<4x16xf32>
    %256 = arith.divf %254, %255 : vector<4x16xf32>
    %257 = vector.extract_strided_slice %256 {offsets = [0, 0], sizes = [4, 8], strides = [1, 1]} : vector<4x16xf32> to vector<4x8xf32>
    %258 = arith.mulf %257, %201 : vector<4x8xf32>
    %259 = vector.extract_strided_slice %256 {offsets = [0, 8], sizes = [4, 8], strides = [1, 1]} : vector<4x16xf32> to vector<4x8xf32>
    %260 = arith.mulf %259, %250 : vector<4x8xf32>
    %261 = arith.addf %258, %260 : vector<4x8xf32>
    %262 = vector.extract_strided_slice %18 {offsets = [32, 0], sizes = [4, 80], strides = [1, 1]} : vector<48x80xf32> to vector<4x80xf32>
    %cst_63 = arith.constant dense<0.000000e+00> : vector<4x80xf32>
    %263 = tpu.matmul %220, %2, %cst_63 {dimension_numbers = #tpu.dot_dimension_numbers<[1], [0], [0], [1], [0, 0, 1, 1], [], []>} : vector<4x20xf32>, vector<20x80xf32>, vector<4x80xf32> -> vector<4x80xf32>
    %264 = arith.addf %262, %263 : vector<4x80xf32>
    %265 = vector.extract_strided_slice %264 {offsets = [0, 0], sizes = [4, 60], strides = [1, 1]} : vector<4x80xf32> to vector<4x60xf32>
    %266 = arith.negf %265 : vector<4x60xf32>
    %267 = math.exp %266 : vector<4x60xf32>
    %cst_64 = arith.constant 1.000000e+00 : f32
    %268 = vector.broadcast %cst_64 : f32 to vector<4x60xf32>
    %269 = arith.addf %268, %267 : vector<4x60xf32>
    %270 = arith.divf %268, %269 : vector<4x60xf32>
    %271 = vector.extract_strided_slice %264 {offsets = [0, 60], sizes = [4, 20], strides = [1, 1]} : vector<4x80xf32> to vector<4x20xf32>
    %272 = math.tanh %271 : vector<4x20xf32>
    %273 = vector.extract_strided_slice %270 {offsets = [0, 0], sizes = [4, 20], strides = [1, 1]} : vector<4x60xf32> to vector<4x20xf32>
    %274 = vector.extract_strided_slice %270 {offsets = [0, 20], sizes = [4, 20], strides = [1, 1]} : vector<4x60xf32> to vector<4x20xf32>
    %275 = vector.extract_strided_slice %270 {offsets = [0, 40], sizes = [4, 20], strides = [1, 1]} : vector<4x60xf32> to vector<4x20xf32>
    %276 = arith.mulf %274, %218 : vector<4x20xf32>
    %277 = arith.mulf %273, %272 : vector<4x20xf32>
    %278 = arith.addf %276, %277 : vector<4x20xf32>
    %279 = math.tanh %278 : vector<4x20xf32>
    %280 = arith.mulf %275, %279 : vector<4x20xf32>
    %281 = tpu.concatenate %218, %278 in 1 : vector<4x20xf32>, vector<4x20xf32> -> vector<4x40xf32>
    %cst_65 = arith.constant dense<0.000000e+00> : vector<4x16xf32>
    %282 = tpu.matmul %281, %4, %cst_65 {dimension_numbers = #tpu.dot_dimension_numbers<[1], [0], [0], [1], [0, 0, 1, 1], [], []>} : vector<4x40xf32>, vector<40x16xf32>, vector<4x16xf32> -> vector<4x16xf32>
    %283 = vector.broadcast %5 : vector<1x16xf32> to vector<4x16xf32>
    %284 = arith.addf %282, %283 : vector<4x16xf32>
    %cst_66 = arith.constant 0.000000e+00 : f32
    %285 = vector.broadcast %cst_66 : f32 to vector<4x16xf32>
    %286 = arith.maximumf %284, %285 : vector<4x16xf32>
    %cst_67 = arith.constant dense<0.000000e+00> : vector<4x40xf32>
    %287 = tpu.matmul %286, %6, %cst_67 {dimension_numbers = #tpu.dot_dimension_numbers<[1], [0], [0], [1], [0, 0, 1, 1], [], []>} : vector<4x16xf32>, vector<16x40xf32>, vector<4x40xf32> -> vector<4x40xf32>
    %288 = vector.broadcast %7 : vector<1x40xf32> to vector<4x40xf32>
    %289 = arith.addf %287, %288 : vector<4x40xf32>
    %cst_68 = arith.constant dense<0xFF800000> : vector<4xf32>
    %290 = vector.multi_reduction <maximumf>, %289, %cst_68 [1] : vector<4x40xf32> to vector<4xf32>
    %291 = vector.shape_cast %290 : vector<4xf32> to vector<4x1xf32>
    %292 = vector.broadcast %291 : vector<4x1xf32> to vector<4x40xf32>
    %293 = arith.subf %289, %292 : vector<4x40xf32>
    %294 = math.exp %293 : vector<4x40xf32>
    %cst_69 = arith.constant dense<0.000000e+00> : vector<4xf32>
    %295 = vector.multi_reduction <add>, %294, %cst_69 [1] : vector<4x40xf32> to vector<4xf32>
    %296 = vector.shape_cast %295 : vector<4xf32> to vector<4x1xf32>
    %297 = vector.broadcast %296 : vector<4x1xf32> to vector<4x40xf32>
    %298 = arith.divf %294, %297 : vector<4x40xf32>
    %299 = arith.mulf %298, %281 : vector<4x40xf32>
    %300 = tpu.concatenate %299, %261 in 1 : vector<4x40xf32>, vector<4x8xf32> -> vector<4x48xf32>
    %cst_70 = arith.constant dense<0.000000e+00> : vector<4x48xf32>
    %301 = tpu.matmul %300, %8, %cst_70 {dimension_numbers = #tpu.dot_dimension_numbers<[1], [0], [0], [1], [0, 0, 1, 1], [], []>} : vector<4x48xf32>, vector<48x48xf32>, vector<4x48xf32> -> vector<4x48xf32>
    %302 = vector.broadcast %9 : vector<1x48xf32> to vector<4x48xf32>
    %303 = arith.addf %301, %302 : vector<4x48xf32>
    %cst_71 = arith.constant 0.000000e+00 : f32
    %304 = vector.broadcast %cst_71 : f32 to vector<4x48xf32>
    %305 = arith.maximumf %303, %304 : vector<4x48xf32>
    %cst_72 = arith.constant dense<0.000000e+00> : vector<4x24xf32>
    %306 = tpu.matmul %305, %10, %cst_72 {dimension_numbers = #tpu.dot_dimension_numbers<[1], [0], [0], [1], [0, 0, 1, 1], [], []>} : vector<4x48xf32>, vector<48x24xf32>, vector<4x24xf32> -> vector<4x24xf32>
    %307 = vector.broadcast %11 : vector<1x24xf32> to vector<4x24xf32>
    %308 = arith.addf %306, %307 : vector<4x24xf32>
    %309 = vector.extract_strided_slice %308 {offsets = [0, 0], sizes = [4, 8], strides = [1, 1]} : vector<4x24xf32> to vector<4x8xf32>
    %310 = math.tanh %309 : vector<4x8xf32>
    %311 = vector.extract_strided_slice %308 {offsets = [0, 8], sizes = [4, 16], strides = [1, 1]} : vector<4x24xf32> to vector<4x16xf32>
    %312 = arith.negf %311 : vector<4x16xf32>
    %313 = math.exp %312 : vector<4x16xf32>
    %cst_73 = arith.constant 1.000000e+00 : f32
    %314 = vector.broadcast %cst_73 : f32 to vector<4x16xf32>
    %315 = arith.addf %314, %313 : vector<4x16xf32>
    %316 = arith.divf %314, %315 : vector<4x16xf32>
    %317 = vector.extract_strided_slice %316 {offsets = [0, 0], sizes = [4, 8], strides = [1, 1]} : vector<4x16xf32> to vector<4x8xf32>
    %318 = arith.mulf %317, %261 : vector<4x8xf32>
    %319 = vector.extract_strided_slice %316 {offsets = [0, 8], sizes = [4, 8], strides = [1, 1]} : vector<4x16xf32> to vector<4x8xf32>
    %320 = arith.mulf %319, %310 : vector<4x8xf32>
    %321 = arith.addf %318, %320 : vector<4x8xf32>
    %322 = vector.extract_strided_slice %18 {offsets = [40, 0], sizes = [4, 80], strides = [1, 1]} : vector<48x80xf32> to vector<4x80xf32>
    %cst_74 = arith.constant dense<0.000000e+00> : vector<4x80xf32>
    %323 = tpu.matmul %280, %2, %cst_74 {dimension_numbers = #tpu.dot_dimension_numbers<[1], [0], [0], [1], [0, 0, 1, 1], [], []>} : vector<4x20xf32>, vector<20x80xf32>, vector<4x80xf32> -> vector<4x80xf32>
    %324 = arith.addf %322, %323 : vector<4x80xf32>
    %325 = vector.extract_strided_slice %324 {offsets = [0, 0], sizes = [4, 60], strides = [1, 1]} : vector<4x80xf32> to vector<4x60xf32>
    %326 = arith.negf %325 : vector<4x60xf32>
    %327 = math.exp %326 : vector<4x60xf32>
    %cst_75 = arith.constant 1.000000e+00 : f32
    %328 = vector.broadcast %cst_75 : f32 to vector<4x60xf32>
    %329 = arith.addf %328, %327 : vector<4x60xf32>
    %330 = arith.divf %328, %329 : vector<4x60xf32>
    %331 = vector.extract_strided_slice %324 {offsets = [0, 60], sizes = [4, 20], strides = [1, 1]} : vector<4x80xf32> to vector<4x20xf32>
    %332 = math.tanh %331 : vector<4x20xf32>
    %333 = vector.extract_strided_slice %330 {offsets = [0, 0], sizes = [4, 20], strides = [1, 1]} : vector<4x60xf32> to vector<4x20xf32>
    %334 = vector.extract_strided_slice %330 {offsets = [0, 20], sizes = [4, 20], strides = [1, 1]} : vector<4x60xf32> to vector<4x20xf32>
    %335 = vector.extract_strided_slice %330 {offsets = [0, 40], sizes = [4, 20], strides = [1, 1]} : vector<4x60xf32> to vector<4x20xf32>
    %336 = arith.mulf %334, %278 : vector<4x20xf32>
    %337 = arith.mulf %333, %332 : vector<4x20xf32>
    %338 = arith.addf %336, %337 : vector<4x20xf32>
    %339 = math.tanh %338 : vector<4x20xf32>
    %340 = arith.mulf %335, %339 : vector<4x20xf32>
    %341 = tpu.concatenate %278, %338 in 1 : vector<4x20xf32>, vector<4x20xf32> -> vector<4x40xf32>
    %cst_76 = arith.constant dense<0.000000e+00> : vector<4x16xf32>
    %342 = tpu.matmul %341, %4, %cst_76 {dimension_numbers = #tpu.dot_dimension_numbers<[1], [0], [0], [1], [0, 0, 1, 1], [], []>} : vector<4x40xf32>, vector<40x16xf32>, vector<4x16xf32> -> vector<4x16xf32>
    %343 = vector.broadcast %5 : vector<1x16xf32> to vector<4x16xf32>
    %344 = arith.addf %342, %343 : vector<4x16xf32>
    %cst_77 = arith.constant 0.000000e+00 : f32
    %345 = vector.broadcast %cst_77 : f32 to vector<4x16xf32>
    %346 = arith.maximumf %344, %345 : vector<4x16xf32>
    %cst_78 = arith.constant dense<0.000000e+00> : vector<4x40xf32>
    %347 = tpu.matmul %346, %6, %cst_78 {dimension_numbers = #tpu.dot_dimension_numbers<[1], [0], [0], [1], [0, 0, 1, 1], [], []>} : vector<4x16xf32>, vector<16x40xf32>, vector<4x40xf32> -> vector<4x40xf32>
    %348 = vector.broadcast %7 : vector<1x40xf32> to vector<4x40xf32>
    %349 = arith.addf %347, %348 : vector<4x40xf32>
    %cst_79 = arith.constant dense<0xFF800000> : vector<4xf32>
    %350 = vector.multi_reduction <maximumf>, %349, %cst_79 [1] : vector<4x40xf32> to vector<4xf32>
    %351 = vector.shape_cast %350 : vector<4xf32> to vector<4x1xf32>
    %352 = vector.broadcast %351 : vector<4x1xf32> to vector<4x40xf32>
    %353 = arith.subf %349, %352 : vector<4x40xf32>
    %354 = math.exp %353 : vector<4x40xf32>
    %cst_80 = arith.constant dense<0.000000e+00> : vector<4xf32>
    %355 = vector.multi_reduction <add>, %354, %cst_80 [1] : vector<4x40xf32> to vector<4xf32>
    %356 = vector.shape_cast %355 : vector<4xf32> to vector<4x1xf32>
    %357 = vector.broadcast %356 : vector<4x1xf32> to vector<4x40xf32>
    %358 = arith.divf %354, %357 : vector<4x40xf32>
    %359 = arith.mulf %358, %341 : vector<4x40xf32>
    %360 = tpu.concatenate %359, %321 in 1 : vector<4x40xf32>, vector<4x8xf32> -> vector<4x48xf32>
    %cst_81 = arith.constant dense<0.000000e+00> : vector<4x48xf32>
    %361 = tpu.matmul %360, %8, %cst_81 {dimension_numbers = #tpu.dot_dimension_numbers<[1], [0], [0], [1], [0, 0, 1, 1], [], []>} : vector<4x48xf32>, vector<48x48xf32>, vector<4x48xf32> -> vector<4x48xf32>
    %362 = vector.broadcast %9 : vector<1x48xf32> to vector<4x48xf32>
    %363 = arith.addf %361, %362 : vector<4x48xf32>
    %cst_82 = arith.constant 0.000000e+00 : f32
    %364 = vector.broadcast %cst_82 : f32 to vector<4x48xf32>
    %365 = arith.maximumf %363, %364 : vector<4x48xf32>
    %cst_83 = arith.constant dense<0.000000e+00> : vector<4x24xf32>
    %366 = tpu.matmul %365, %10, %cst_83 {dimension_numbers = #tpu.dot_dimension_numbers<[1], [0], [0], [1], [0, 0, 1, 1], [], []>} : vector<4x48xf32>, vector<48x24xf32>, vector<4x24xf32> -> vector<4x24xf32>
    %367 = vector.broadcast %11 : vector<1x24xf32> to vector<4x24xf32>
    %368 = arith.addf %366, %367 : vector<4x24xf32>
    %369 = vector.extract_strided_slice %368 {offsets = [0, 0], sizes = [4, 8], strides = [1, 1]} : vector<4x24xf32> to vector<4x8xf32>
    %370 = math.tanh %369 : vector<4x8xf32>
    %371 = vector.extract_strided_slice %368 {offsets = [0, 8], sizes = [4, 16], strides = [1, 1]} : vector<4x24xf32> to vector<4x16xf32>
    %372 = arith.negf %371 : vector<4x16xf32>
    %373 = math.exp %372 : vector<4x16xf32>
    %cst_84 = arith.constant 1.000000e+00 : f32
    %374 = vector.broadcast %cst_84 : f32 to vector<4x16xf32>
    %375 = arith.addf %374, %373 : vector<4x16xf32>
    %376 = arith.divf %374, %375 : vector<4x16xf32>
    %377 = vector.extract_strided_slice %376 {offsets = [0, 0], sizes = [4, 8], strides = [1, 1]} : vector<4x16xf32> to vector<4x8xf32>
    %378 = arith.mulf %377, %321 : vector<4x8xf32>
    %379 = vector.extract_strided_slice %376 {offsets = [0, 8], sizes = [4, 8], strides = [1, 1]} : vector<4x16xf32> to vector<4x8xf32>
    %380 = arith.mulf %379, %370 : vector<4x8xf32>
    %381 = arith.addf %378, %380 : vector<4x8xf32>
    %382 = vector.extract_strided_slice %12 {offsets = [0, 0], sizes = [20, 16], strides = [1, 1]} : vector<28x16xf32> to vector<20x16xf32>
    %cst_85 = arith.constant dense<0.000000e+00> : vector<4x16xf32>
    %383 = tpu.matmul %340, %382, %cst_85 {dimension_numbers = #tpu.dot_dimension_numbers<[1], [0], [0], [1], [0, 0, 1, 1], [], []>} : vector<4x20xf32>, vector<20x16xf32>, vector<4x16xf32> -> vector<4x16xf32>
    %384 = vector.extract_strided_slice %12 {offsets = [20, 0], sizes = [8, 16], strides = [1, 1]} : vector<28x16xf32> to vector<8x16xf32>
    %cst_86 = arith.constant dense<0.000000e+00> : vector<4x16xf32>
    %385 = tpu.matmul %381, %384, %cst_86 {dimension_numbers = #tpu.dot_dimension_numbers<[1], [0], [0], [1], [0, 0, 1, 1], [], []>} : vector<4x8xf32>, vector<8x16xf32>, vector<4x16xf32> -> vector<4x16xf32>
    %386 = arith.addf %383, %385 : vector<4x16xf32>
    %387 = vector.broadcast %13 : vector<1x16xf32> to vector<4x16xf32>
    %388 = arith.addf %386, %387 : vector<4x16xf32>
    %cst_87 = arith.constant 0.000000e+00 : f32
    %389 = vector.broadcast %cst_87 : f32 to vector<4x16xf32>
    %390 = arith.maximumf %388, %389 : vector<4x16xf32>
    %cst_88 = arith.constant dense<0.000000e+00> : vector<4x128xf32>
    %391 = tpu.matmul %390, %14, %cst_88 {dimension_numbers = #tpu.dot_dimension_numbers<[1], [0], [0], [1], [0, 0, 1, 1], [], []>} : vector<4x16xf32>, vector<16x128xf32>, vector<4x128xf32> -> vector<4x128xf32>
    %392 = vector.broadcast %15 : vector<1x128xf32> to vector<4x128xf32>
    %393 = arith.addf %391, %392 : vector<4x128xf32>
    %c0_89 = arith.constant 0 : index
    %c0_90 = arith.constant 0 : index
    %394 = vector.load %arg1[%c0_89, %c0_90] : memref<4x128xf32, #tpu.memory_space<vmem>>, vector<4x128xf32>
    tpu.vector_store %arg1[%c0_89, %c0_90], %393 {strides = array<i32>} : memref<4x128xf32, #tpu.memory_space<vmem>>, vector<4x128xf32>,
    return
  }
}

</mosaic_0001>

<bundles_post_ra>
// kernel: tpu_custom_call.1
= control target key start
LH: loop header
LB: loop body
LE: loop exit
PB: predicated region body
PF: predicated region fallthrough
CT: control target
= control target key end

     0   :  { %6 = vsyncpa [#allocation3], 0  ;;  %s2302_s0 = inlined_call_operand.hbm [shape: f32[368,128], index: 0, kind: input, shape index: {}]   ;;  %s2303_s1 = inlined_call_operand.hbm [shape: f32[4,128], index: 1, kind: output, shape index: {}]  }
   0x1   :  { %7 = vsyncpa [#allocation4], 0  ;;  %s12_s8 = sshll.u32 %s2302_s0, 4  ;;  %s1834_s9 = smov [#allocation2]   ;;  %s13_s8 = int_to_ptr.hbm [resolvable:$true] %s12_s8 }
   0x2   :  { %s14_s10 = sshll.u32 %s1834_s9, 4  ;;  %s1835_s11 = smov 128   ;;  %s15_s10 = int_to_ptr.vmem [resolvable:$true] %s14_s10 }
   0x3   :  { %s1836_s12 = smov 8  }
   0x4   :  { %20 = dma.hbm_to_vmem [thread:$0]  %s13_s8, 5888, %s15_s10, [#allocation3], %s1835_s11, %s1835_s11, %s1836_s12  }
   0x5   :  { %1830 = dma.done.wait [#allocation3], 5888  }
   0x6   :  { %1831 = vsyncadd [#allocation3], 4294961408  ;;  %vm89_vm0 = vcmask 1044480   ;;  %vm134_vm1 = vcmask 1043456   ;;  %v33_v0 = vld [vmem:[#allocation2 + $0x50] sm:$0x1f] }
   0x7   :  { %v32_v1 = vld [vmem:[#allocation2 + $0x48] sm:$0xff]  ;;  %1586 = vmatpush.msk.msra.mxu0 %vm89_vm0, %v33_v0  ;;  %v31_v3 = vld [vmem:[#allocation2 + $0x40] sm:$0xff]  ;;  %vm70_vm2 = vcmask 171008   ;;  %v1867_v6 = vld [vmem:[#allocation2 + $0x58] sm:$0xff]  ;;  %v1837_v7 = vmov 0.0   ;;  %s1838_s0 = smov 68  }
   0x8   :  { %v1861_v2 = vld [vmem:[#allocation2 + $0x68] sm:$0xf]  ;;  %v1865_v4 = vld [vmem:[#allocation2 + $0x60] sm:$0xff]  ;;  %v1872_v8 = vld [vmem:[#allocation2 + $0x70] ss:$0 sm:$0xff]  ;;  %s1839_s13 = smov 20  }
   0x9   :  { %1593 = vmatpush.msk.msra.mxu1 %vm134_vm1, %v1861_v2  ;;  %v25_v5 = vld [vmem:[#allocation2] sm:$0xff]  ;;  %107 = vmatpush.msra.mxu0 %v32_v1  ;;  %v128_v14 = vld [vmem:[#allocation2 + $0x30] sm:$0xf]  ;;  %v1877_v18 = vld [vmem:[#allocation2 + $0x98] sm:$0xff]  ;;  %vm130_vm7 = vcmask 162816   ;;  %vm202_vm8 = vcmask 326656  }
   0xa   :  { %v1879_v19 = vld [vmem:[#allocation2 + $0x90] sm:$0xff]  ;;  %217 = vmatpush.msra.mxu2 %v1877_v18  ;;  %v1883_v21 = vld [vmem:[#allocation2 + $0x88] sm:$0xff]  ;;  %v1890_v33 = vld [vmem:[#allocation2 + $0x80] sm:$0xff]  ;;  %s1840_s14 = smov 88   ;;  %vm228_vm9 = vcmask 130048   ;;  %vm252_vm10 = vcmask 322560  }
   0xb   :  { %152 = vmatpush.msra.mxu1 %v1865_v4  ;;  %108 = vmatpush.msra.mxu0 %v31_v3  ;;  %v1894_v34 = vld [vmem:[#allocation2 + $0x78] sm:$0xff]  ;;  %v1916_v41 = vld [vmem:[#allocation2 + $0xb0] sm:$0xff]  ;;  %v1919_v42 = vld [vmem:[#allocation2 + $0xa8] sm:$0xff]  ;;  %s1841_s15 = smov 40   ;;  %s1842_s16 = smov 108  }
   0xc   :  { %1587 = vmatmul.msk.f32.vlgmr.msra.gmra.mxu0 %vm70_vm2, %v25_v5  ;;  %218 = vmatpush.msra.mxu2 %v1879_v19  ;;  %v1923_v45 = vld [vmem:[#allocation2 + $0xa0] ss:$0 sm:$0xff]  ;;  %v26_v49 = vld [vmem:[#allocation2 + $0x8] sm:$0xff]  ;;  %v1929_v51 = vld [vmem:[#allocation2 + $0xb8] ss:$0 sm:$0xff]  ;;  %s1843_s17 = smov 16  }
   0xd   :  { %153 = vmatpush.msra.mxu1 %v1867_v6  ;;  %895 = vmatpush.msrb.mxu0 %v1877_v18  ;;  %v1935_v60 = vld [vmem:[#allocation2 + $0x38] sm:$0xf]  ;;  %s1844_s18 = smov 120   ;;  %s1845_s19 = smov 32  }
   0xe   :  { %154 = vmatmul.f32.vlgmr.msra.gmra.mxu1 %v1837_v7  ;;  %219 = vmatpush.msra.mxu2 %v1883_v21  ;;  %s1846_s20 = smov [#allocation5]   ;;  %s1576_s24 = sshll.u32 %s2303_s1, 4  ;;  %s1577_s24 = int_to_ptr.hbm [resolvable:$true] %s1576_s24 }
   0xf   :  { %896 = vmatpush.msrb.mxu0 %v1879_v19  ;;  %246 = vmatpush.msra.mxu3 %v1916_v41  ;;  %s1574_s21 = sshll.u32 %s1846_s20, 4  ;;  %s1575_s21 = int_to_ptr.vmem [resolvable:$true] %s1574_s21 }
  0x10   :  { %220 = vmatpush.msra.mxu2 %v1890_v33 }
  0x11   :  { %897 = vmatpush.msrb.mxu0 %v1883_v21  ;;  %247 = vmatpush.msra.mxu3 %v1919_v42 }
  0x12   :  { %221 = vmatpush.msra.mxu2 %v1894_v34 }
  0x13   :  { %898 = vmatpush.msrb.mxu0 %v1890_v33 }
  0x14   :  { %1600 = vmatpush.msk.msrb.mxu2 %vm134_vm1, %v1861_v2  ;;  %1588 = vmatmul.msk.f32.gmra.mxu0 %vm70_vm2, %v26_v49 }
  0x15   :  { %899 = vmatpush.msrb.mxu0 %v1894_v34 }
  0x16   :  { %386 = vmatpush.msrb.mxu2 %v1865_v4 }
  0x17   :  { %1624 = vmatpush.msk.msra.mxu0 %vm134_vm1, %v1861_v2 }
  0x18   :  { %387 = vmatpush.msrb.mxu2 %v1867_v6 }
  0x19   :  { %1055 = vmatpush.msra.mxu0 %v1865_v4 }
  0x1b   :  { %1056 = vmatpush.msra.mxu0 %v1867_v6 }
  0x89   :  { %v110_v9 = vpop.f32.mrf.mxu0 }
  0x8a   :  { %v111_v11 = vadd.f32 %v1872_v8, %v110_v9 }
  0x8b   :  { %v155_v10 = vpop.f32.mrf.mxu1 }
  0x8c   :  { %v158_v12 = vadd.f32 %v155_v10, %v111_v11 }
  0x8e   :  { %1664 = vtanh.f32 %v158_v12  ;;  %v1594_v15 = vmul.f32 -1.442695, %v158_v12 }
  0x90   :  { %1666 = vpow2.f32 %v1594_v15 }
  0x91   :  { %v113_v55 = vpop.f32.mrf.mxu0 }
  0x92   :  { %v114_v56 = vadd.f32 %v1872_v8, %v113_v55  ;;  %v1995_v55 = vld [vmem:[#allocation2 + $0x110] sm:$0xff] }
  0x94   :  { %v1665_v13 = vpop.eup %1664 }
  0x95   :  { %185 = vrot.lane.b32.xlu0 %v1665_v13, %s1838_s0 }
  0x96   :  { %v1667_v16 = vpop.eup %1666 }
  0x97   :  { %v162_v17 = vadd.f32 1.0, %v1667_v16 }
  0x99   :  { %1668 = vrcp.f32 %v162_v17  ;;  %v174_v26 = vand.u32 2147483648, %v162_v17  ;;  %vm168_vm4 = vweird.f32 %v162_v17  ;;  %v172_v27 = vand.u32 2147483647, %v162_v17 }
  0x9b   :  { %v175_v29 = vor.u32 1.1754944e-38, %v174_v26  ;;  %vm173_vm6 = vcmp.eq.f32.partialorder %v172_v27, 8.507059e+37  ;;  %v1955_v26 = vld [vmem:[#allocation2 + $0xd8] sm:$0xff]  ;;  %v1958_v27 = vld [vmem:[#allocation2 + $0xd0] sm:$0xff] }
  0x9d   :  { %180 = vrot.lane.b32.xlu0 %v128_v14, %s1839_s13 }
  0x9f   :  { %v1669_v20 = vpop.eup %1668 }
  0xa0   :  { %v164_v22 = vmul.f32 %v1669_v20, %v162_v17  ;;  %vm169_vm3 = vweird.f32 %v1669_v20 }
  0xa1   :  { %vm170_vm5 = vmor %vm168_vm4, %vm169_vm3 }
  0xa2   :  { %v165_v23 = vsub.f32 1.0, %v164_v22 }
  0xa4   :  { %v166_v24 = vmul.f32 %v1669_v20, %v165_v23 }
  0xa6   :  { %v167_v25 = vadd.f32 %v1669_v20, %v166_v24  ;;  %v1948_v24 = vld [vmem:[#allocation2 + $0xe8] sm:$0xff] }
  0xa7   :  { %298 = vmatpush.msrb.mxu3 %v1948_v24 }
  0xa8   :  { %v171_v28 = vsel %vm170_vm5, %v1669_v20, %v167_v25  ;;  %v1952_v25 = vld [vmem:[#allocation2 + $0xe0] sm:$0xff]  ;;  %vm284_vm5 = vcmask 392192  }
  0xa9   :  { %v176_v31 = vsel %vm173_vm6, %v175_v29, %v171_v28  ;;  %299 = vmatpush.msrb.mxu3 %v1952_v25  ;;  %v1962_v28 = vld [vmem:[#allocation2 + $0xc8] sm:$0xff]  ;;  %v1968_v29 = vld [vmem:[#allocation2 + $0xc0] sm:$0xff] }
  0xab   :  { %300 = vmatpush.msrb.mxu3 %v1955_v26 }
  0xad   :  { %301 = vmatpush.msrb.mxu3 %v1958_v27 }
  0xaf   :  { %302 = vmatpush.msrb.mxu3 %v1962_v28 }
  0xb1   :  { %303 = vmatpush.msrb.mxu3 %v1968_v29 }
 0x107   :  { %v186_v30 = vpop.permute.xlu0 %185 }
 0x108   :  { %v188_v32 = vmul.f32 %v186_v30, %v176_v31 }
 0x10a   :  { %190 = vrot.lane.b32.xlu1 %v188_v32, %s1839_s13 }
 0x10f   :  { %v181_v35 = vpop.permute.xlu0 %180 }
 0x110   :  { %v183_v36 = vmul.f32 %v181_v35, %v176_v31 }
 0x17c   :  { %v191_v37 = vpop.permute.xlu1 %190 }
 0x17d   :  { %v1906_v38 = vadd.f32 %v191_v37, %v183_v36 }
 0x17f   :  { %1670 = vtanh.f32 %v1906_v38  ;;  %v1911_v39 = vsel %vm130_vm7, %v128_v14, %v1906_v38 }
 0x180   :  { %1595 = vmatmul.msk.f32.vlgmr.msra.gmra.mxu2 %vm202_vm8, %v1911_v39 }
 0x181   :  { %525 = vmatpush.msra.mxu2 %v1948_v24 }
 0x183   :  { %526 = vmatpush.msra.mxu2 %v1952_v25 }
 0x185   :  { %v1671_v40 = vpop.eup %1670  ;;  %527 = vmatpush.msra.mxu2 %v1955_v26 }
 0x186   :  { %196 = vrot.lane.b32.xlu1 %v1671_v40, %s1839_s13 }
 0x187   :  { %528 = vmatpush.msra.mxu2 %v1958_v27 }
 0x189   :  { %529 = vmatpush.msra.mxu2 %v1962_v28 }
 0x18b   :  { %530 = vmatpush.msra.mxu2 %v1968_v29 }
 0x1f8   :  { %v197_v43 = vpop.permute.xlu1 %196 }
 0x1f9   :  { %v199_v44 = vmul.f32 %v197_v43, %v176_v31 }
 0x1fb   :  { %368 = vrot.lane.b32.xlu2 %v199_v44, %s1840_s14 }
 0x203   :  { %v223_v46 = vpop.f32.mrf.mxu2 }
 0x204   :  { %v224_v47 = vadd.f32 %v1923_v45, %v223_v46 }
 0x206   :  { %v226_v48 = vmax.f32 %v224_v47, 0.0 }
 0x208   :  { %1596 = vmatmul.msk.f32.vlgmr.msra.gmra.mxu3 %vm228_vm9, %v226_v48 }
 0x209   :  { %449 = vmatpush.msra.mxu3 %v1877_v18 }
 0x20b   :  { %450 = vmatpush.msra.mxu3 %v1879_v19 }
 0x20d   :  { %451 = vmatpush.msra.mxu3 %v1883_v21 }
 0x20f   :  { %452 = vmatpush.msra.mxu3 %v1890_v33 }
 0x211   :  { %453 = vmatpush.msra.mxu3 %v1894_v34 }
 0x255   :  { %v369_v50 = vpop.permute.xlu2 %368 }
 0x256   :  { %1601 = vmatmul.msk.f32.vlgmr.msrb.gmra.mxu2 %vm130_vm7, %v369_v50 }
 0x257   :  { %672 = vmatpush.msrb.mxu2 %v1877_v18 }
 0x259   :  { %673 = vmatpush.msrb.mxu2 %v1879_v19 }
 0x25b   :  { %674 = vmatpush.msrb.mxu2 %v1883_v21 }
 0x25d   :  { %675 = vmatpush.msrb.mxu2 %v1890_v33 }
 0x25f   :  { %676 = vmatpush.msrb.mxu2 %v1894_v34 }
 0x28b   :  { %v249_v52 = vpop.f32.mrf.mxu3 }
 0x28c   :  { %v250_v53 = vadd.f32 %v1929_v51, %v249_v52 }
 0x28e   :  { %v253_v54 = vsel %vm252_vm10, %v250_v53, -inf }
 0x28f   :  { %254 = vmax.xlane.f32.xlu2 %v253_v54  ;;  %v1992_v54 = vld [vmem:[#allocation2 + $0x118] sm:$0xff] }
 0x2d9   :  { %v389_v57 = vpop.f32.mrf.mxu2 }
 0x2da   :  { %v392_v58 = vadd.f32 %v389_v57, %v114_v56 }
 0x2dc   :  { %1672 = vtanh.f32 %v392_v58  ;;  %v1602_v3 = vmul.f32 -1.442695, %v392_v58 }
 0x2e2   :  { %v1673_v59 = vpop.eup %1672 }
 0x2e3   :  { %415 = vrot.lane.b32.xlu0 %v1673_v59, %s1838_s0 }
 0x2eb   :  { %279 = vrot.lane.b32.xlu0 %v1935_v60, %s1841_s15 }
 0x302   :  { %v255_v61 = vpop.xlane.xlu2 %254 }
 0x303   :  { %v256_v62 = vsub.f32 %v250_v53, %v255_v61  ;;  %v1990_v53 = vld [vmem:[#allocation2 + $0x120] sm:$0xff] }
 0x304   :  { %323 = vmatpush.msrb.mxu1 %v1990_v53 }
 0x305   :  { %v257_v63 = vmul.f32 1.442695, %v256_v62  ;;  %v2016_v62 = vld [vmem:[#allocation2 + $0x100] sm:$0xff] }
 0x306   :  { %324 = vmatpush.msrb.mxu1 %v1992_v54 }
 0x307   :  { %1674 = vpow2.f32 %v257_v63  ;;  %v2019_v63 = vld [vmem:[#allocation2 + $0xf8] sm:$0xff] }
 0x308   :  { %1676 = vpow2.f32 %v1602_v3  ;;  %325 = vmatpush.msrb.mxu1 %v1995_v55 }
 0x30d   :  { %v1938_v0 = vpop.eup %1674 }
 0x30e   :  { %v259_v1 = vsel %vm252_vm10, %v1938_v0, 0.0  ;;  %v1677_v5 = vpop.eup %1676 }
 0x30f   :  { %260 = vadd.xlane.f32.xlu1 %v259_v1  ;;  %v396_v7 = vadd.f32 1.0, %v1677_v5 }
 0x311   :  { %1678 = vrcp.f32 %v396_v7  ;;  %v408_v14 = vand.u32 2147483648, %v396_v7  ;;  %vm402_vm12 = vweird.f32 %v396_v7  ;;  %v406_v15 = vand.u32 2147483647, %v396_v7 }
 0x313   :  { %v409_v17 = vor.u32 1.1754944e-38, %v408_v14  ;;  %vm407_vm14 = vcmp.eq.f32.partialorder %v406_v15, 8.507059e+37  ;;  %v2045_v14 = vld [vmem:[#allocation2 + $0x128] ss:$0 sm:$0xff] }
 0x317   :  { %v1679_v9 = vpop.eup %1678 }
 0x318   :  { %v398_v10 = vmul.f32 %v1679_v9, %v396_v7  ;;  %vm403_vm11 = vweird.f32 %v1679_v9 }
 0x319   :  { %vm404_vm13 = vmor %vm402_vm12, %vm403_vm11 }
 0x31a   :  { %v399_v11 = vsub.f32 1.0, %v398_v10 }
 0x31c   :  { %v400_v12 = vmul.f32 %v1679_v9, %v399_v11 }
 0x31e   :  { %v401_v13 = vadd.f32 %v1679_v9, %v400_v12 }
 0x320   :  { %v405_v16 = vsel %vm404_vm13, %v1679_v9, %v401_v13  ;;  %v27_v13 = vld [vmem:[#allocation2 + $0x10] sm:$0xff] }
 0x321   :  { %v1942_v22 = vsel %vm407_vm14, %v409_v17, %v405_v16  ;;  %1589 = vmatmul.msk.f32.gmra.mxu0 %vm70_vm2, %v27_v13 }
 0x355   :  { %v416_v20 = vpop.permute.xlu0 %415 }
 0x356   :  { %v418_v23 = vmul.f32 %v416_v20, %v1942_v22 }
 0x358   :  { %420 = vrot.lane.b32.xlu0 %v418_v23, %s1839_s13 }
 0x35d   :  { %v280_v49 = vpop.permute.xlu0 %279 }
 0x360   :  { %431 = vrot.lane.b32.xlu0 %v1906_v38, %s1842_s16 }
 0x382   :  { %v261_v30 = vpop.xlane.xlu1 %260 }
 0x383   :  { %1680 = vrcp.f32 %v261_v30  ;;  %v273_v36 = vand.u32 2147483648, %v261_v30  ;;  %v271_v40 = vand.u32 2147483647, %v261_v30  ;;  %vm267_vm0 = vweird.f32 %v261_v30 }
 0x385   :  { %v274_v44 = vor.u32 1.1754944e-38, %v273_v36  ;;  %vm272_vm4 = vcmp.eq.f32.partialorder %v271_v40, 8.507059e+37 }
 0x389   :  { %v1681_v31 = vpop.eup %1680 }
 0x38a   :  { %v263_v32 = vmul.f32 %v1681_v31, %v261_v30  ;;  %vm268_vm15 = vweird.f32 %v1681_v31 }
 0x38b   :  { %vm269_vm3 = vmor %vm267_vm0, %vm268_vm15 }
 0x38c   :  { %v264_v35 = vsub.f32 1.0, %v263_v32 }
 0x38e   :  { %v265_v37 = vmul.f32 %v1681_v31, %v264_v35 }
 0x390   :  { %v266_v43 = vadd.f32 %v1681_v31, %v265_v37 }
 0x392   :  { %v270_v46 = vsel %vm269_vm3, %v1681_v31, %v266_v43 }
 0x393   :  { %v275_v47 = vsel %vm272_vm4, %v274_v44, %v270_v46 }
 0x394   :  { %v276_v48 = vmul.f32 %v1938_v0, %v275_v47  ;;  %v2024_v0 = vld [vmem:[#allocation2 + $0xf0] ss:$0 sm:$0xff] }
 0x396   :  { %v277_v50 = vmul.f32 %v276_v48, %v1911_v39  ;;  %v413_v39 = vmul.f32 %v1942_v22, %v1906_v38  ;;  %v2013_v38 = vld [vmem:[#allocation2 + $0x108] sm:$0xff] }
 0x397   :  { %326 = vmatpush.msrb.mxu1 %v2013_v38 }
 0x398   :  { %v282_v52 = vsel %vm202_vm8, %v277_v50, %v280_v49 }
 0x399   :  { %1597 = vmatmul.msk.f32.vlgmr.msrb.gmra.mxu3 %vm284_vm5, %v282_v52  ;;  %327 = vmatpush.msrb.mxu1 %v2016_v62 }
 0x39a   :  { %1608 = vmatpush.msk.msrb.mxu3 %vm134_vm1, %v1861_v2 }
 0x39b   :  { %328 = vmatpush.msrb.mxu1 %v2019_v63 }
 0x39c   :  { %609 = vmatpush.msrb.mxu3 %v1865_v4 }
 0x39d   :  { %476 = vmatpush.msra.mxu1 %v1916_v41 }
 0x39e   :  { %610 = vmatpush.msrb.mxu3 %v1867_v6  ;;  %v116_v49 = vpop.f32.mrf.mxu0 }
 0x39f   :  { %477 = vmatpush.msra.mxu1 %v1919_v42  ;;  %v117_v50 = vadd.f32 %v1872_v8, %v116_v49 }
 0x3ca   :  { %v421_v56 = vpop.permute.xlu0 %420 }
 0x3cb   :  { %v2001_v57 = vadd.f32 %v421_v56, %v413_v39 }
 0x3cd   :  { %1682 = vtanh.f32 %v2001_v57 }
 0x3d2   :  { %v432_v58 = vpop.permute.xlu0 %431 }
 0x3d3   :  { %v1683_v59 = vpop.eup %1682  ;;  %v2006_v61 = vsel %vm130_vm7, %v432_v58, %v2001_v57 }
 0x3d4   :  { %426 = vrot.lane.b32.xlu0 %v1683_v59, %s1839_s13  ;;  %1603 = vmatmul.msk.f32.vlgmr.msra.gmra.mxu3 %vm202_vm8, %v2006_v61 }
 0x3d5   :  { %699 = vmatpush.msra.mxu3 %v1916_v41 }
 0x3d7   :  { %700 = vmatpush.msra.mxu3 %v1919_v42 }
 0x41c   :  { %v305_v1 = vpop.f32.mrf.mxu3 }
 0x41d   :  { %v306_v3 = vadd.f32 %v2024_v0, %v305_v1 }
 0x41f   :  { %v308_v5 = vmax.f32 %v306_v3, 0.0 }
 0x421   :  { %1598 = vmatmul.msk.f32.vlgmr.msrb.gmra.mxu1 %vm284_vm5, %v308_v5 }
 0x422   :  { %549 = vmatpush.msrb.mxu1 %v1990_v53 }
 0x424   :  { %550 = vmatpush.msrb.mxu1 %v1992_v54 }
 0x426   :  { %551 = vmatpush.msrb.mxu1 %v1995_v55 }
 0x428   :  { %552 = vmatpush.msrb.mxu1 %v2013_v38 }
 0x42a   :  { %553 = vmatpush.msrb.mxu1 %v2016_v62 }
 0x42c   :  { %554 = vmatpush.msrb.mxu1 %v2019_v63 }
 0x446   :  { %v427_v7 = vpop.permute.xlu0 %426 }
 0x447   :  { %v429_v9 = vmul.f32 %v427_v7, %v1942_v22 }
 0x449   :  { %591 = vrot.lane.b32.xlu2 %v429_v9, %s1840_s14 }
 0x457   :  { %v455_v10 = vpop.f32.mrf.mxu3 }
 0x458   :  { %v456_v11 = vadd.f32 %v1923_v45, %v455_v10 }
 0x45a   :  { %v458_v12 = vmax.f32 %v456_v11, 0.0 }
 0x45c   :  { %1604 = vmatmul.msk.f32.vlgmr.msra.gmra.mxu1 %vm228_vm9, %v458_v12 }
 0x45d   :  { %748 = vmatpush.msra.mxu1 %v1948_v24 }
 0x45f   :  { %749 = vmatpush.msra.mxu1 %v1952_v25 }
 0x461   :  { %750 = vmatpush.msra.mxu1 %v1955_v26 }
 0x463   :  { %751 = vmatpush.msra.mxu1 %v1958_v27 }
 0x465   :  { %752 = vmatpush.msra.mxu1 %v1962_v28 }
 0x467   :  { %753 = vmatpush.msra.mxu1 %v1968_v29 }
 0x49e   :  { %v330_v15 = vpop.f32.mrf.mxu1 }
 0x49f   :  { %v331_v16 = vadd.f32 %v2045_v14, %v330_v15 }
 0x4a1   :  { %1684 = vtanh.f32 %v331_v16  ;;  %v1599_v31 = vmul.f32 -1.442695, %v331_v16 }
 0x4a3   :  { %v592_v17 = vpop.permute.xlu2 %591  ;;  %1686 = vpow2.f32 %v1599_v31 }
 0x4a4   :  { %1609 = vmatmul.msk.f32.vlgmr.msrb.gmra.mxu3 %vm130_vm7, %v592_v17 }
 0x4a5   :  { %1616 = vmatpush.msk.msrb.mxu3 %vm134_vm1, %v1861_v2 }
 0x4a7   :  { %v1685_v20 = vpop.eup %1684  ;;  %832 = vmatpush.msrb.mxu3 %v1865_v4 }
 0x4a8   :  { %358 = vrot.lane.b32.xlu0 %v1685_v20, %s1843_s17 }
 0x4a9   :  { %833 = vmatpush.msrb.mxu3 %v1867_v6  ;;  %v1687_v2 = vpop.eup %1686 }
 0x4aa   :  { %v337_v32 = vadd.f32 1.0, %v1687_v2 }
 0x4ac   :  { %1688 = vrcp.f32 %v337_v32  ;;  %v349_v6 = vand.u32 2147483648, %v337_v32  ;;  %vm343_vm11 = vweird.f32 %v337_v32 }
 0x4ae   :  { %v350_v44 = vor.u32 1.1754944e-38, %v349_v6 }
 0x4b0   :  { %353 = vrot.lane.b32.xlu0 %v1935_v60, %s1836_s12  ;;  %v347_v60 = vand.u32 2147483647, %v337_v32 }
 0x4b2   :  { %v1689_v4 = vpop.eup %1688  ;;  %vm348_vm13 = vcmp.eq.f32.partialorder %v347_v60, 8.507059e+37 }
 0x4b3   :  { %v339_v35 = vmul.f32 %v1689_v4, %v337_v32  ;;  %vm344_vm6 = vweird.f32 %v1689_v4 }
 0x4b4   :  { %vm345_vm12 = vmor %vm343_vm11, %vm344_vm6 }
 0x4b5   :  { %v340_v36 = vsub.f32 1.0, %v339_v35 }
 0x4b7   :  { %v341_v37 = vmul.f32 %v1689_v4, %v340_v36 }
 0x4b9   :  { %v342_v40 = vadd.f32 %v1689_v4, %v341_v37 }
 0x4bb   :  { %v346_v43 = vsel %vm345_vm12, %v1689_v4, %v342_v40 }
 0x4bc   :  { %v351_v46 = vsel %vm348_vm13, %v350_v44, %v346_v43 }
 0x4d9   :  { %v479_v22 = vpop.f32.mrf.mxu1 }
 0x4da   :  { %v480_v23 = vadd.f32 %v1929_v51, %v479_v22 }
 0x4dc   :  { %v482_v30 = vsel %vm252_vm10, %v480_v23, -inf }
 0x4dd   :  { %483 = vmax.xlane.f32.xlu1 %v482_v30 }
 0x51a   :  { %v359_v47 = vpop.permute.xlu0 %358 }
 0x51b   :  { %v361_v48 = vmul.f32 %v359_v47, %v351_v46 }
 0x51d   :  { %363 = vrot.lane.b32.xlu1 %v361_v48, %s1844_s18 }
 0x522   :  { %v354_v11 = vpop.permute.xlu0 %353 }
 0x523   :  { %v356_v13 = vmul.f32 %v354_v11, %v351_v46 }
 0x525   :  { %654 = vrot.lane.b32.xlu1 %v2001_v57, %s1842_s16 }
 0x527   :  { %v612_v52 = vpop.f32.mrf.mxu3 }
 0x528   :  { %v615_v39 = vadd.f32 %v612_v52, %v117_v50 }
 0x52a   :  { %1690 = vtanh.f32 %v615_v39  ;;  %v1610_v7 = vmul.f32 -1.442695, %v615_v39 }
 0x530   :  { %v1691_v56 = vpop.eup %1690 }
 0x531   :  { %638 = vrot.lane.b32.xlu0 %v1691_v56, %s1838_s0 }
 0x550   :  { %v484_v58 = vpop.xlane.xlu1 %483 }
 0x551   :  { %v485_v59 = vsub.f32 %v480_v23, %v484_v58 }
 0x553   :  { %v486_v1 = vmul.f32 1.442695, %v485_v59 }
 0x555   :  { %1692 = vpow2.f32 %v486_v1 }
 0x556   :  { %1694 = vpow2.f32 %v1610_v7 }
 0x55b   :  { %v1693_v3 = vpop.eup %1692 }
 0x55c   :  { %v488_v5 = vsel %vm252_vm10, %v1693_v3, 0.0  ;;  %v1695_v9 = vpop.eup %1694 }
 0x55d   :  { %489 = vadd.xlane.f32.xlu2 %v488_v5  ;;  %v619_v10 = vadd.f32 1.0, %v1695_v9 }
 0x55f   :  { %1696 = vrcp.f32 %v619_v10  ;;  %v631_v30 = vand.u32 2147483648, %v619_v10  ;;  %vm625_vm15 = vweird.f32 %v619_v10  ;;  %v629_v31 = vand.u32 2147483647, %v619_v10 }
 0x561   :  { %v632_v32 = vor.u32 1.1754944e-38, %v631_v30  ;;  %vm630_vm3 = vcmp.eq.f32.partialorder %v629_v31, 8.507059e+37 }
 0x565   :  { %v1697_v12 = vpop.eup %1696 }
 0x566   :  { %v621_v17 = vmul.f32 %v1697_v12, %v619_v10  ;;  %vm626_vm14 = vweird.f32 %v1697_v12 }
 0x567   :  { %vm627_vm0 = vmor %vm625_vm15, %vm626_vm14 }
 0x568   :  { %v622_v20 = vsub.f32 1.0, %v621_v17 }
 0x56a   :  { %v623_v22 = vmul.f32 %v1697_v12, %v622_v20  ;;  %v28_v20 = vld [vmem:[#allocation2 + $0x18] sm:$0xff] }
 0x56b   :  { %1590 = vmatmul.msk.f32.gmra.mxu0 %vm70_vm2, %v28_v20 }
 0x56c   :  { %v624_v23 = vadd.f32 %v1697_v12, %v623_v22 }
 0x56e   :  { %v628_v2 = vsel %vm627_vm0, %v1697_v12, %v624_v23 }
 0x56f   :  { %v633_v35 = vsel %vm630_vm3, %v632_v32, %v628_v2 }
 0x570   :  { %v636_v59 = vmul.f32 %v633_v35, %v2001_v57 }
 0x58f   :  { %v364_v15 = vpop.permute.xlu1 %363 }
 0x590   :  { %v2064_v16 = vadd.f32 %v364_v15, %v356_v13 }
 0x592   :  { %508 = vrot.lane.b32.xlu0 %v2064_v16, %s1845_s19 }
 0x5a3   :  { %v639_v4 = vpop.permute.xlu0 %638 }
 0x5a4   :  { %v641_v36 = vmul.f32 %v639_v4, %v633_v35 }
 0x5a6   :  { %643 = vrot.lane.b32.xlu0 %v641_v36, %s1839_s13 }
 0x5d0   :  { %v490_v37 = vpop.xlane.xlu2 %489 }
 0x5d1   :  { %1698 = vrcp.f32 %v490_v37  ;;  %v502_v46 = vand.u32 2147483648, %v490_v37  ;;  %vm496_vm6 = vweird.f32 %v490_v37  ;;  %v500_v47 = vand.u32 2147483647, %v490_v37 }
 0x5d3   :  { %v503_v49 = vor.u32 1.1754944e-38, %v502_v46  ;;  %vm501_vm12 = vcmp.eq.f32.partialorder %v500_v47, 8.507059e+37 }
 0x5d7   :  { %v1699_v40 = vpop.eup %1698 }
 0x5d8   :  { %v492_v6 = vmul.f32 %v1699_v40, %v490_v37  ;;  %vm497_vm4 = vweird.f32 %v1699_v40 }
 0x5d9   :  { %vm498_vm11 = vmor %vm496_vm6, %vm497_vm4 }
 0x5da   :  { %v493_v60 = vsub.f32 1.0, %v492_v6 }
 0x5dc   :  { %v494_v43 = vmul.f32 %v1699_v40, %v493_v60 }
 0x5de   :  { %v495_v44 = vadd.f32 %v1699_v40, %v494_v43 }
 0x5e0   :  { %v499_v48 = vsel %vm498_vm11, %v1699_v40, %v495_v44 }
 0x5e1   :  { %v504_v50 = vsel %vm501_vm12, %v503_v49, %v499_v48 }
 0x5e2   :  { %v505_v52 = vmul.f32 %v1693_v3, %v504_v50  ;;  %v655_v3 = vpop.permute.xlu1 %654 }
 0x5e4   :  { %v506_v39 = vmul.f32 %v505_v52, %v2006_v61 }
 0x604   :  { %v509_v56 = vpop.permute.xlu0 %508 }
 0x605   :  { %v511_v58 = vsel %vm202_vm8, %v506_v39, %v509_v56  ;;  %v119_v39 = vpop.f32.mrf.mxu0 }
 0x606   :  { %1605 = vmatmul.msk.f32.vlgmr.msra.gmra.mxu2 %vm284_vm5, %v511_v58  ;;  %v120_v58 = vadd.f32 %v1872_v8, %v119_v39 }
 0x607   :  { %772 = vmatpush.msra.mxu2 %v1990_v53 }
 0x609   :  { %773 = vmatpush.msra.mxu2 %v1992_v54 }
 0x60b   :  { %774 = vmatpush.msra.mxu2 %v1995_v55 }
 0x60d   :  { %775 = vmatpush.msra.mxu2 %v2013_v38 }
 0x60f   :  { %776 = vmatpush.msra.mxu2 %v2016_v62 }
 0x611   :  { %777 = vmatpush.msra.mxu2 %v2019_v63 }
 0x618   :  { %v644_v61 = vpop.permute.xlu0 %643 }
 0x619   :  { %v2079_v1 = vadd.f32 %v644_v61, %v636_v59 }
 0x61b   :  { %1700 = vtanh.f32 %v2079_v1  ;;  %v2084_v5 = vsel %vm130_vm7, %v655_v3, %v2079_v1 }
 0x61c   :  { %1611 = vmatmul.msk.f32.vlgmr.msrb.gmra.mxu2 %vm202_vm8, %v2084_v5 }
 0x61d   :  { %995 = vmatpush.msrb.mxu2 %v1990_v53 }
 0x61f   :  { %996 = vmatpush.msrb.mxu2 %v1992_v54 }
 0x621   :  { %v1701_v7 = vpop.eup %1700  ;;  %997 = vmatpush.msrb.mxu2 %v1995_v55 }
 0x622   :  { %649 = vrot.lane.b32.xlu0 %v1701_v7, %s1839_s13 }
 0x623   :  { %998 = vmatpush.msrb.mxu2 %v2013_v38 }
 0x625   :  { %999 = vmatpush.msrb.mxu2 %v2016_v62 }
 0x627   :  { %1000 = vmatpush.msrb.mxu2 %v2019_v63 }
 0x689   :  { %v532_v57 = vpop.f32.mrf.mxu2 }
 0x68a   :  { %v533_v9 = vadd.f32 %v2024_v0, %v532_v57 }
 0x68c   :  { %v535_v10 = vmax.f32 %v533_v9, 0.0 }
 0x68e   :  { %1606 = vmatmul.msk.f32.vlgmr.msrb.gmra.mxu1 %vm284_vm5, %v535_v10 }
 0x68f   :  { %922 = vmatpush.msrb.mxu1 %v1916_v41 }
 0x691   :  { %923 = vmatpush.msrb.mxu1 %v1919_v42 }
 0x694   :  { %v650_v11 = vpop.permute.xlu0 %649 }
 0x695   :  { %v652_v12 = vmul.f32 %v650_v11, %v633_v35 }
 0x697   :  { %814 = vrot.lane.b32.xlu1 %v652_v12, %s1840_s14 }
 0x69f   :  { %v678_v13 = vpop.f32.mrf.mxu2 }
 0x6a0   :  { %v679_v15 = vadd.f32 %v1923_v45, %v678_v13 }
 0x6a2   :  { %v681_v17 = vmax.f32 %v679_v15, 0.0 }
 0x6a4   :  { %1612 = vmatmul.msk.f32.vlgmr.msra.gmra.mxu3 %vm228_vm9, %v681_v17 }
 0x6a5   :  { %971 = vmatpush.msra.mxu3 %v1948_v24 }
 0x6a7   :  { %972 = vmatpush.msra.mxu3 %v1952_v25 }
 0x6a9   :  { %973 = vmatpush.msra.mxu3 %v1955_v26 }
 0x6ab   :  { %974 = vmatpush.msra.mxu3 %v1958_v27 }
 0x6ad   :  { %975 = vmatpush.msra.mxu3 %v1962_v28 }
 0x6af   :  { %976 = vmatpush.msra.mxu3 %v1968_v29 }
 0x709   :  { %v815_v22 = vpop.permute.xlu1 %814 }
 0x70a   :  { %1617 = vmatmul.msk.f32.vlgmr.msrb.gmra.mxu3 %vm130_vm7, %v815_v22 }
 0x70b   :  { %v556_v23 = vpop.f32.mrf.mxu1  ;;  %1194 = vmatpush.msrb.mxu3 %v1948_v24 }
 0x70c   :  { %v557_v30 = vadd.f32 %v2045_v14, %v556_v23 }
 0x70d   :  { %1195 = vmatpush.msrb.mxu3 %v1952_v25 }
 0x70e   :  { %1702 = vtanh.f32 %v557_v30  ;;  %v1607_v35 = vmul.f32 -1.442695, %v557_v30 }
 0x70f   :  { %1196 = vmatpush.msrb.mxu3 %v1955_v26 }
 0x710   :  { %1704 = vpow2.f32 %v1607_v35 }
 0x711   :  { %1197 = vmatpush.msrb.mxu3 %v1958_v27 }
 0x713   :  { %1198 = vmatpush.msrb.mxu3 %v1962_v28 }
 0x714   :  { %v1703_v31 = vpop.eup %1702 }
 0x715   :  { %581 = vrot.lane.b32.xlu0 %v1703_v31, %s1843_s17  ;;  %1199 = vmatpush.msrb.mxu3 %v1968_v29 }
 0x716   :  { %v1705_v36 = vpop.eup %1704 }
 0x717   :  { %v563_v37 = vadd.f32 1.0, %v1705_v36 }
 0x719   :  { %1706 = vrcp.f32 %v563_v37  ;;  %v575_v46 = vand.u32 2147483648, %v563_v37  ;;  %vm569_vm14 = vweird.f32 %v563_v37  ;;  %v573_v47 = vand.u32 2147483647, %v563_v37 }
 0x71b   :  { %v576_v49 = vor.u32 1.1754944e-38, %v575_v46  ;;  %vm574_vm0 = vcmp.eq.f32.partialorder %v573_v47, 8.507059e+37 }
 0x71f   :  { %v1707_v40 = vpop.eup %1706 }
 0x720   :  { %v565_v6 = vmul.f32 %v1707_v40, %v563_v37  ;;  %vm570_vm13 = vweird.f32 %v1707_v40 }
 0x721   :  { %vm571_vm15 = vmor %vm569_vm14, %vm570_vm13 }
 0x722   :  { %v566_v60 = vsub.f32 1.0, %v565_v6 }
 0x724   :  { %v567_v43 = vmul.f32 %v1707_v40, %v566_v60 }
 0x726   :  { %v568_v44 = vadd.f32 %v1707_v40, %v567_v43 }
 0x727   :  { %v702_v2 = vpop.f32.mrf.mxu3 }
 0x728   :  { %v703_v32 = vadd.f32 %v1929_v51, %v702_v2  ;;  %v572_v48 = vsel %vm571_vm15, %v1707_v40, %v568_v44  ;;  %v30_v44 = vld [vmem:[#allocation2 + $0x28] sm:$0xff] }
 0x729   :  { %v577_v50 = vsel %vm574_vm0, %v576_v49, %v572_v48 }
 0x72a   :  { %v705_v4 = vsel %vm252_vm10, %v703_v32, -inf  ;;  %v579_v23 = vmul.f32 %v577_v50, %v2064_v16  ;;  %v29_v16 = vld [vmem:[#allocation2 + $0x20] sm:$0xff] }
 0x72b   :  { %706 = vmax.xlane.f32.xlu1 %v705_v4  ;;  %1591 = vmatmul.msk.f32.gmra.mxu0 %vm70_vm2, %v29_v16 }
 0x733   :  { %1592 = vmatmul.msk.f32.gmra.mxu0 %vm70_vm2, %v30_v44 }
 0x744   :  { %877 = vrot.lane.b32.xlu1 %v2079_v1, %s1842_s16 }
 0x787   :  { %v582_v52 = vpop.permute.xlu0 %581 }
 0x788   :  { %v584_v56 = vmul.f32 %v582_v52, %v577_v50 }
 0x78a   :  { %586 = vrot.lane.b32.xlu0 %v584_v56, %s1844_s18 }
 0x78d   :  { %v835_v59 = vpop.f32.mrf.mxu3 }
 0x78e   :  { %v838_v61 = vadd.f32 %v835_v59, %v120_v58 }
 0x790   :  { %1708 = vtanh.f32 %v838_v61  ;;  %v1618_v12 = vmul.f32 -1.442695, %v838_v61 }
 0x796   :  { %v1709_v3 = vpop.eup %1708 }
 0x797   :  { %861 = vrot.lane.b32.xlu2 %v1709_v3, %s1838_s0 }
 0x79e   :  { %v707_v7 = vpop.xlane.xlu1 %706 }
 0x79f   :  { %v708_v57 = vsub.f32 %v703_v32, %v707_v7 }
 0x7a1   :  { %v709_v9 = vmul.f32 1.442695, %v708_v57 }
 0x7a3   :  { %1710 = vpow2.f32 %v709_v9 }
 0x7a4   :  { %1712 = vpow2.f32 %v1618_v12 }
 0x7a9   :  { %v1711_v10 = vpop.eup %1710 }
 0x7aa   :  { %v711_v11 = vsel %vm252_vm10, %v1711_v10, 0.0  ;;  %v1713_v13 = vpop.eup %1712 }
 0x7ab   :  { %v842_v15 = vadd.f32 1.0, %v1713_v13 }
 0x7ad   :  { %1714 = vrcp.f32 %v842_v15  ;;  %v854_v32 = vand.u32 2147483648, %v842_v15  ;;  %vm848_vm4 = vweird.f32 %v842_v15  ;;  %v852_v4 = vand.u32 2147483647, %v842_v15 }
 0x7af   :  { %v855_v37 = vor.u32 1.1754944e-38, %v854_v32  ;;  %vm853_vm11 = vcmp.eq.f32.partialorder %v852_v4, 8.507059e+37  ;;  %v1774_v32 = vld [vmem:[#allocation2 + $0x58] sm:$0xff] }
 0x7b3   :  { %v1715_v8 = vpop.eup %1714 }
 0x7b4   :  { %712 = vadd.xlane.f32.xlu0 %v711_v11  ;;  %v844_v17 = vmul.f32 %v1715_v8, %v842_v15  ;;  %vm849_vm3 = vweird.f32 %v1715_v8  ;;  %v122_v15 = vpop.f32.mrf.mxu0 }
 0x7b5   :  { %vm850_vm6 = vmor %vm848_vm4, %vm849_vm3 }
 0x7b6   :  { %v845_v20 = vsub.f32 1.0, %v844_v17 }
 0x7b8   :  { %v846_v22 = vmul.f32 %v1715_v8, %v845_v20 }
 0x7ba   :  { %v847_v31 = vadd.f32 %v1715_v8, %v846_v22 }
 0x7bc   :  { %v851_v35 = vsel %vm850_vm6, %v1715_v8, %v847_v31  ;;  %v2156_v17 = vpop.f32.mrf.mxu0  ;;  %v1773_v31 = vld [vmem:[#allocation2 + $0x60] sm:$0xff] }
 0x7bd   :  { %v856_v40 = vsel %vm853_vm11, %v855_v37, %v851_v35 }
 0x7be   :  { %v859_v57 = vmul.f32 %v856_v40, %v2079_v1 }
 0x7f1   :  { %v862_v36 = vpop.permute.xlu2 %861 }
 0x7f2   :  { %v864_v6 = vmul.f32 %v862_v36, %v856_v40 }
 0x7fc   :  { %v587_v30 = vpop.permute.xlu0 %586 }
 0x7fd   :  { %v2127_v2 = vadd.f32 %v587_v30, %v579_v23  ;;  %v1772_v30 = vld [vmem:[#allocation2 + $0x68] sm:$0xf] }
 0x7ff   :  { %731 = vrot.lane.b32.xlu2 %v2127_v2, %s1845_s19 }
 0x807   :  { %866 = vrot.lane.b32.xlu2 %v864_v6, %s1839_s13 }
 0x827   :  { %v713_v60 = vpop.xlane.xlu0 %712 }
 0x828   :  { %1716 = vrcp.f32 %v713_v60  ;;  %v725_v50 = vand.u32 2147483648, %v713_v60  ;;  %vm719_vm13 = vweird.f32 %v713_v60  ;;  %v723_v52 = vand.u32 2147483647, %v713_v60 }
 0x82a   :  { %v726_v56 = vor.u32 1.1754944e-38, %v725_v50  ;;  %vm724_vm15 = vcmp.eq.f32.partialorder %v723_v52, 8.507059e+37 }
 0x82e   :  { %v1717_v43 = vpop.eup %1716 }
 0x82f   :  { %v715_v46 = vmul.f32 %v1717_v43, %v713_v60  ;;  %vm720_vm12 = vweird.f32 %v1717_v43 }
 0x830   :  { %vm721_vm14 = vmor %vm719_vm13, %vm720_vm12 }
 0x831   :  { %v716_v47 = vsub.f32 1.0, %v715_v46 }
 0x833   :  { %v717_v48 = vmul.f32 %v1717_v43, %v716_v47 }
 0x835   :  { %v718_v49 = vadd.f32 %v1717_v43, %v717_v48  ;;  %v2179_v48 = vld [vmem:[#allocation2 + $0x70] ss:$0 sm:$0xff] }
 0x837   :  { %v722_v39 = vsel %vm721_vm14, %v1717_v43, %v718_v49  ;;  %v123_v49 = vadd.f32 %v2179_v48, %v122_v15 }
 0x838   :  { %v727_v58 = vsel %vm724_vm15, %v726_v56, %v722_v39 }
 0x839   :  { %v728_v59 = vmul.f32 %v1711_v10, %v727_v58  ;;  %v878_v10 = vpop.permute.xlu1 %877 }
 0x83b   :  { %v729_v61 = vmul.f32 %v728_v59, %v2084_v5 }
 0x859   :  { %v732_v3 = vpop.permute.xlu2 %731 }
 0x85a   :  { %v734_v7 = vsel %vm202_vm8, %v729_v61, %v732_v3 }
 0x85b   :  { %1613 = vmatmul.msk.f32.vlgmr.msra.gmra.mxu1 %vm284_vm5, %v734_v7 }
 0x85c   :  { %1118 = vmatpush.msra.mxu1 %v1877_v18 }
 0x85e   :  { %1119 = vmatpush.msra.mxu1 %v1879_v19 }
 0x860   :  { %1120 = vmatpush.msra.mxu1 %v1883_v21 }
 0x861   :  { %v867_v9 = vpop.permute.xlu2 %866 }
 0x862   :  { %v2141_v11 = vadd.f32 %v867_v9, %v859_v57  ;;  %1121 = vmatpush.msra.mxu1 %v1890_v33 }
 0x864   :  { %1718 = vtanh.f32 %v2141_v11  ;;  %v2147_v5 = vsel %vm130_vm7, %v878_v10, %v2141_v11  ;;  %1122 = vmatpush.msra.mxu1 %v1894_v34 }
 0x865   :  { %1619 = vmatmul.msk.f32.vlgmr.msrb.gmra.mxu0 %vm202_vm8, %v2147_v5 }
 0x866   :  { %1145 = vmatpush.msrb.mxu0 %v1916_v41 }
 0x868   :  { %1146 = vmatpush.msrb.mxu0 %v1919_v42 }
 0x86a   :  { %v1719_v1 = vpop.eup %1718 }
 0x86b   :  { %872 = vrot.lane.b32.xlu2 %v1719_v1, %s1839_s13 }
 0x8c5   :  { %v873_v12 = vpop.permute.xlu2 %872 }
 0x8c6   :  { %v875_v13 = vmul.f32 %v873_v12, %v856_v40 }
 0x8c8   :  { %1037 = vrot.lane.b32.xlu0 %v875_v13, %s1840_s14 }
 0x8d8   :  { %v755_v8 = vpop.f32.mrf.mxu1 }
 0x8d9   :  { %v756_v20 = vadd.f32 %v2024_v0, %v755_v8 }
 0x8db   :  { %v758_v22 = vmax.f32 %v756_v20, 0.0 }
 0x8dd   :  { %1614 = vmatmul.msk.f32.vlgmr.msra.gmra.mxu2 %vm284_vm5, %v758_v22 }
 0x8de   :  { %1218 = vmatpush.msra.mxu2 %v1990_v53 }
 0x8e0   :  { %1219 = vmatpush.msra.mxu2 %v1992_v54 }
 0x8e2   :  { %v901_v41 = vpop.f32.mrf.mxu0  ;;  %1220 = vmatpush.msra.mxu2 %v1995_v55 }
 0x8e3   :  { %v902_v42 = vadd.f32 %v1923_v45, %v901_v41 }
 0x8e4   :  { %1221 = vmatpush.msra.mxu2 %v2013_v38 }
 0x8e5   :  { %v904_v23 = vmax.f32 %v902_v42, 0.0 }
 0x8e6   :  { %1222 = vmatpush.msra.mxu2 %v2016_v62 }
 0x8e7   :  { %1620 = vmatmul.msk.f32.vlgmr.msrb.gmra.mxu1 %vm228_vm9, %v904_v23 }
 0x8e8   :  { %1632 = vmatpush.msk.msrb.mxu1 %vm134_vm1, %v1772_v30  ;;  %1223 = vmatpush.msra.mxu2 %v2019_v63 }
 0x8ea   :  { %1278 = vmatpush.msrb.mxu1 %v1773_v31 }
 0x8ec   :  { %1279 = vmatpush.msrb.mxu1 %v1774_v32 }
 0x93a   :  { %v1038_v4 = vpop.permute.xlu0 %1037 }
 0x93b   :  { %1625 = vmatmul.msk.f32.vlgmr.msra.gmra.mxu0 %vm130_vm7, %v1038_v4 }
 0x93c   :  { %1341 = vmatpush.msra.mxu0 %v1877_v18 }
 0x93e   :  { %1342 = vmatpush.msra.mxu0 %v1879_v19 }
 0x940   :  { %1343 = vmatpush.msra.mxu0 %v1883_v21 }
 0x942   :  { %1344 = vmatpush.msra.mxu0 %v1890_v33 }
 0x944   :  { %1345 = vmatpush.msra.mxu0 %v1894_v34 }
 0x960   :  { %v779_v45 = vpop.f32.mrf.mxu2 }
 0x961   :  { %v780_v35 = vadd.f32 %v2045_v14, %v779_v45 }
 0x963   :  { %1720 = vtanh.f32 %v780_v35  ;;  %v1615_v19 = vmul.f32 -1.442695, %v780_v35 }
 0x964   :  { %v925_v37 = vpop.f32.mrf.mxu1 }
 0x965   :  { %v926_v40 = vadd.f32 %v1929_v51, %v925_v37  ;;  %1722 = vpow2.f32 %v1615_v19 }
 0x967   :  { %v928_v18 = vsel %vm252_vm10, %v926_v40, -inf }
 0x969   :  { %v1721_v36 = vpop.eup %1720 }
 0x96a   :  { %804 = vrot.lane.b32.xlu2 %v1721_v36, %s1843_s17 }
 0x96b   :  { %v1723_v21 = vpop.eup %1722 }
 0x96c   :  { %v786_v6 = vadd.f32 1.0, %v1723_v21 }
 0x96e   :  { %1724 = vrcp.f32 %v786_v6  ;;  %v798_v44 = vand.u32 2147483648, %v786_v6  ;;  %vm792_vm0 = vweird.f32 %v786_v6  ;;  %v796_v46 = vand.u32 2147483647, %v786_v6 }
 0x970   :  { %v799_v50 = vor.u32 1.1754944e-38, %v798_v44  ;;  %vm797_vm4 = vcmp.eq.f32.partialorder %v796_v46, 8.507059e+37 }
 0x974   :  { %v1725_v33 = vpop.eup %1724 }
 0x975   :  { %v788_v34 = vmul.f32 %v1725_v33, %v786_v6  ;;  %vm793_vm2 = vweird.f32 %v1725_v33 }
 0x976   :  { %vm794_vm3 = vmor %vm792_vm0, %vm793_vm2 }
 0x977   :  { %v789_v16 = vsub.f32 1.0, %v788_v34 }
 0x979   :  { %v790_v60 = vmul.f32 %v1725_v33, %v789_v16 }
 0x97b   :  { %v791_v43 = vadd.f32 %v1725_v33, %v790_v60 }
 0x97d   :  { %v795_v51 = vsel %vm794_vm3, %v1725_v33, %v791_v43 }
 0x97e   :  { %v800_v39 = vsel %vm797_vm4, %v799_v50, %v795_v51  ;;  %v1776_v51 = vld [vmem:[#allocation2 + $0xb0] sm:$0xff] }
 0x97f   :  { %v802_v22 = vmul.f32 %v800_v39, %v2127_v2 }
 0x993   :  { %929 = vmax.xlane.f32.xlu2 %v928_v18 }
 0x9b8   :  { %v1058_v47 = vpop.f32.mrf.mxu0 }
 0x9b9   :  { %v1061_v52 = vadd.f32 %v1058_v47, %v123_v49  ;;  %v1777_v49 = vld [vmem:[#allocation2 + $0xa8] sm:$0xff] }
 0x9bb   :  { %1726 = vtanh.f32 %v1061_v52  ;;  %v1626_v10 = vmul.f32 -1.442695, %v1061_v52 }
 0x9c1   :  { %v1727_v59 = vpop.eup %1726 }
 0x9c4   :  { %v805_v56 = vpop.permute.xlu2 %804 }
 0x9c5   :  { %v807_v58 = vmul.f32 %v805_v56, %v800_v39 }
 0x9c7   :  { %809 = vrot.lane.b32.xlu1 %v807_v58, %s1844_s18 }
 0x9cf   :  { %1084 = vrot.lane.b32.xlu1 %v1727_v59, %s1838_s0 }
 0xa06   :  { %v930_v61 = vpop.xlane.xlu2 %929 }
 0xa07   :  { %v931_v3 = vsub.f32 %v926_v40, %v930_v61 }
 0xa09   :  { %v932_v7 = vmul.f32 1.442695, %v931_v3 }
 0xa0b   :  { %1728 = vpow2.f32 %v932_v7 }
 0xa0c   :  { %1730 = vpow2.f32 %v1626_v10 }
 0xa11   :  { %v1729_v57 = vpop.eup %1728 }
 0xa12   :  { %v934_v9 = vsel %vm252_vm10, %v1729_v57, 0.0  ;;  %v1731_v1 = vpop.eup %1730 }
 0xa13   :  { %935 = vadd.xlane.f32.xlu0 %v934_v9  ;;  %v1065_v12 = vadd.f32 1.0, %v1731_v1 }
 0xa15   :  { %1732 = vrcp.f32 %v1065_v12  ;;  %v1077_v30 = vand.u32 2147483648, %v1065_v12  ;;  %vm1071_vm11 = vweird.f32 %v1065_v12  ;;  %v1075_v31 = vand.u32 2147483647, %v1065_v12 }
 0xa17   :  { %v1078_v4 = vor.u32 1.1754944e-38, %v1077_v30  ;;  %vm1076_vm13 = vcmp.eq.f32.partialorder %v1075_v31, 8.507059e+37 }
 0xa1b   :  { %v1733_v13 = vpop.eup %1732 }
 0xa1c   :  { %v1067_v15 = vmul.f32 %v1733_v13, %v1065_v12  ;;  %vm1072_vm6 = vweird.f32 %v1733_v13 }
 0xa1d   :  { %vm1073_vm12 = vmor %vm1071_vm11, %vm1072_vm6 }
 0xa1e   :  { %v1068_v8 = vsub.f32 1.0, %v1067_v15 }
 0xa20   :  { %v1069_v20 = vmul.f32 %v1733_v13, %v1068_v8 }
 0xa22   :  { %v1070_v23 = vadd.f32 %v1733_v13, %v1069_v20 }
 0xa24   :  { %v1074_v32 = vsel %vm1073_vm12, %v1733_v13, %v1070_v23 }
 0xa25   :  { %v1079_v35 = vsel %vm1076_vm13, %v1078_v4, %v1074_v32 }
 0xa26   :  { %v1082_v50 = vmul.f32 %v1079_v35, %v2141_v11 }
 0xa39   :  { %v810_v41 = vpop.permute.xlu1 %809 }
 0xa3a   :  { %v2186_v42 = vadd.f32 %v810_v41, %v802_v22 }
 0xa3c   :  { %954 = vrot.lane.b32.xlu1 %v2186_v42, %s1845_s19 }
 0xa41   :  { %v1085_v45 = vpop.permute.xlu1 %1084 }
 0xa42   :  { %v1087_v36 = vmul.f32 %v1085_v45, %v1079_v35 }
 0xa44   :  { %1089 = vrot.lane.b32.xlu1 %v1087_v36, %s1839_s13 }
 0xa4c   :  { %1100 = vrot.lane.b32.xlu1 %v2141_v11, %s1842_s16 }
 0xa86   :  { %v936_v2 = vpop.xlane.xlu0 %935 }
 0xa87   :  { %1734 = vrcp.f32 %v936_v2  ;;  %v948_v6 = vand.u32 2147483648, %v936_v2  ;;  %vm942_vm15 = vweird.f32 %v936_v2  ;;  %v946_v33 = vand.u32 2147483647, %v936_v2 }
 0xa89   :  { %v949_v16 = vor.u32 1.1754944e-38, %v948_v6  ;;  %vm947_vm0 = vcmp.eq.f32.partialorder %v946_v33, 8.507059e+37 }
 0xa8d   :  { %v1735_v37 = vpop.eup %1734 }
 0xa8e   :  { %v938_v40 = vmul.f32 %v1735_v37, %v936_v2  ;;  %vm943_vm14 = vweird.f32 %v1735_v37 }
 0xa8f   :  { %vm944_vm2 = vmor %vm942_vm15, %vm943_vm14 }
 0xa90   :  { %v939_v18 = vsub.f32 1.0, %v938_v40 }
 0xa92   :  { %v940_v19 = vmul.f32 %v1735_v37, %v939_v18 }
 0xa94   :  { %v941_v21 = vadd.f32 %v1735_v37, %v940_v19 }
 0xa96   :  { %v945_v34 = vsel %vm944_vm2, %v1735_v37, %v941_v21 }
 0xa97   :  { %v950_v60 = vsel %vm947_vm0, %v949_v16, %v945_v34 }
 0xa98   :  { %v951_v43 = vmul.f32 %v1729_v57, %v950_v60 }
 0xa9a   :  { %v952_v44 = vmul.f32 %v951_v43, %v2147_v5 }
 0xaae   :  { %v955_v46 = vpop.permute.xlu1 %954 }
 0xaaf   :  { %v957_v47 = vsel %vm202_vm8, %v952_v44, %v955_v46 }
 0xab0   :  { %1621 = vmatmul.msk.f32.vlgmr.msra.gmra.mxu3 %vm284_vm5, %v957_v47 }
 0xab1   :  { %1368 = vmatpush.msra.mxu3 %v1776_v51 }
 0xab3   :  { %1369 = vmatpush.msra.mxu3 %v1777_v49 }
 0xab6   :  { %v1090_v52 = vpop.permute.xlu1 %1089 }
 0xab7   :  { %v2197_v39 = vadd.f32 %v1090_v52, %v1082_v50 }
 0xab9   :  { %1736 = vtanh.f32 %v2197_v39 }
 0xabe   :  { %v1101_v56 = vpop.permute.xlu1 %1100 }
 0xabf   :  { %v1737_v58 = vpop.eup %1736  ;;  %v2202_v5 = vsel %vm130_vm7, %v1101_v56, %v2197_v39 }
 0xac0   :  { %1627 = vmatmul.msk.f32.vlgmr.msra.gmra.mxu1 %vm202_vm8, %v2202_v5  ;;  %1095 = vrot.lane.b32.xlu2 %v1737_v58, %s1839_s13 }
 0xac1   :  { %1417 = vmatpush.msra.mxu1 %v1948_v24 }
 0xac3   :  { %1418 = vmatpush.msra.mxu1 %v1952_v25  ;;  %v2219_v25 = vld [vmem:[#allocation2 + $0xa0] ss:$0 sm:$0xff] }
 0xac5   :  { %1419 = vmatpush.msra.mxu1 %v1955_v26 }
 0xac7   :  { %1420 = vmatpush.msra.mxu1 %v1958_v27 }
 0xac9   :  { %1421 = vmatpush.msra.mxu1 %v1962_v28 }
 0xacb   :  { %1422 = vmatpush.msra.mxu1 %v1968_v29 }
 0xb1a   :  { %v1096_v11 = vpop.permute.xlu2 %1095 }
 0xb1b   :  { %v1098_v59 = vmul.f32 %v1096_v11, %v1079_v35 }
 0xb1d   :  { %1260 = vrot.lane.b32.xlu1 %v1098_v59, %s1840_s14 }
 0xb33   :  { %v978_v61 = vpop.f32.mrf.mxu3 }
 0xb34   :  { %v979_v3 = vadd.f32 %v2024_v0, %v978_v61 }
 0xb36   :  { %v981_v7 = vmax.f32 %v979_v3, 0.0 }
 0xb38   :  { %1622 = vmatmul.msk.f32.vlgmr.msrb.gmra.mxu2 %vm284_vm5, %v981_v7 }
 0xb39   :  { %1441 = vmatpush.msrb.mxu2 %v1990_v53 }
 0xb3b   :  { %1442 = vmatpush.msrb.mxu2 %v1992_v54 }
 0xb3d   :  { %v1124_v24 = vpop.f32.mrf.mxu1  ;;  %1443 = vmatpush.msrb.mxu2 %v1995_v55  ;;  %v2228_v55 = vld [vmem:[#allocation2 + $0xb8] ss:$0 sm:$0xff] }
 0xb3e   :  { %v1125_v26 = vadd.f32 %v2219_v25, %v1124_v24 }
 0xb3f   :  { %1444 = vmatpush.msrb.mxu2 %v2013_v38 }
 0xb40   :  { %v1127_v27 = vmax.f32 %v1125_v26, 0.0 }
 0xb41   :  { %1445 = vmatpush.msrb.mxu2 %v2016_v62 }
 0xb42   :  { %1628 = vmatmul.msk.f32.vlgmr.msrb.gmra.mxu0 %vm228_vm9, %v1127_v27 }
 0xb43   :  { %1446 = vmatpush.msrb.mxu2 %v2019_v63  ;;  %v126_v63 = vadd.f32 %v2179_v48, %v2156_v17 }
 0xb8f   :  { %v1261_v28 = vpop.permute.xlu1 %1260 }
 0xb90   :  { %1633 = vmatmul.msk.f32.vlgmr.msrb.gmra.mxu1 %vm130_vm7, %v1261_v28 }
 0xbbb   :  { %v1002_v29 = vpop.f32.mrf.mxu2 }
 0xbbc   :  { %v1003_v53 = vadd.f32 %v2045_v14, %v1002_v29 }
 0xbbe   :  { %1738 = vtanh.f32 %v1003_v53  ;;  %v1623_v57 = vmul.f32 -1.442695, %v1003_v53 }
 0xbbf   :  { %v1148_v54 = vpop.f32.mrf.mxu0 }
 0xbc0   :  { %v1149_v0 = vadd.f32 %v2228_v55, %v1148_v54  ;;  %1740 = vpow2.f32 %v1623_v57 }
 0xbc2   :  { %v1151_v38 = vsel %vm252_vm10, %v1149_v0, -inf }
 0xbc3   :  { %1152 = vmax.xlane.f32.xlu0 %v1151_v38 }
 0xbc4   :  { %v1739_v62 = vpop.eup %1738 }
 0xbc5   :  { %1027 = vrot.lane.b32.xlu1 %v1739_v62, %s1843_s17 }
 0xbc6   :  { %v1741_v14 = vpop.eup %1740 }
 0xbc7   :  { %v1009_v12 = vadd.f32 1.0, %v1741_v14 }
 0xbc9   :  { %v1021_v17 = vand.u32 2147483648, %v1009_v12  ;;  %vm1015_vm4 = vweird.f32 %v1009_v12  ;;  %v1019_v48 = vand.u32 2147483647, %v1009_v12 }
 0xbcb   :  { %v1022_v23 = vor.u32 1.1754944e-38, %v1021_v17  ;;  %vm1020_vm11 = vcmp.eq.f32.partialorder %v1019_v48, 8.507059e+37 }
 0xc0d   :  { %v1281_v9 = vpop.f32.mrf.mxu1 }
 0xc0e   :  { %v1284_v10 = vadd.f32 %v1281_v9, %v126_v63 }
 0xc10   :  { %1742 = vtanh.f32 %v1284_v10  ;;  %v1634_v37 = vmul.f32 -1.442695, %v1284_v10  ;;  %v2259_v10 = vld [vmem:[#allocation2 + $0xf0] ss:$0 sm:$0xff] }
 0xc11   :  { %1744 = vrcp.f32 %v1009_v12 }
 0xc16   :  { %v1743_v1 = vpop.eup %1742 }
 0xc17   :  { %1307 = vrot.lane.b32.xlu0 %v1743_v1, %s1838_s0  ;;  %v1745_v13 = vpop.eup %1744 }
 0xc18   :  { %v1011_v15 = vmul.f32 %v1745_v13, %v1009_v12  ;;  %vm1016_vm3 = vweird.f32 %v1745_v13 }
 0xc19   :  { %vm1017_vm6 = vmor %vm1015_vm4, %vm1016_vm3 }
 0xc1a   :  { %v1012_v8 = vsub.f32 1.0, %v1011_v15  ;;  %v2265_v15 = vld [vmem:[#allocation2 + $0x128] ss:$0 sm:$0xff] }
 0xc1c   :  { %v1013_v20 = vmul.f32 %v1745_v13, %v1012_v8 }
 0xc1e   :  { %v1014_v22 = vadd.f32 %v1745_v13, %v1013_v20 }
 0xc1f   :  { %1323 = vrot.lane.b32.xlu0 %v2197_v39, %s1842_s16 }
 0xc20   :  { %v1018_v41 = vsel %vm1017_vm6, %v1745_v13, %v1014_v22 }
 0xc21   :  { %v1023_v32 = vsel %vm1020_vm11, %v1022_v23, %v1018_v41 }
 0xc22   :  { %v1025_v34 = vmul.f32 %v1023_v32, %v2186_v42 }
 0xc36   :  { %v1153_v30 = vpop.xlane.xlu0 %1152 }
 0xc37   :  { %v1154_v31 = vsub.f32 %v1149_v0, %v1153_v30  ;;  %v1028_v4 = vpop.permute.xlu1 %1027 }
 0xc38   :  { %v1030_v45 = vmul.f32 %v1028_v4, %v1023_v32 }
 0xc39   :  { %v1155_v35 = vmul.f32 1.442695, %v1154_v31 }
 0xc3a   :  { %1032 = vrot.lane.b32.xlu1 %v1030_v45, %s1844_s18 }
 0xc3b   :  { %1746 = vpow2.f32 %v1155_v35 }
 0xc3c   :  { %1748 = vpow2.f32 %v1634_v37 }
 0xc41   :  { %v1747_v36 = vpop.eup %1746 }
 0xc42   :  { %v1157_v2 = vsel %vm252_vm10, %v1747_v36, 0.0  ;;  %v1749_v40 = vpop.eup %1748 }
 0xc43   :  { %1158 = vadd.xlane.f32.xlu2 %v1157_v2  ;;  %v1288_v18 = vadd.f32 1.0, %v1749_v40 }
 0xc45   :  { %1750 = vrcp.f32 %v1288_v18  ;;  %v1300_v44 = vand.u32 2147483648, %v1288_v18  ;;  %vm1294_vm13 = vweird.f32 %v1288_v18  ;;  %v1298_v46 = vand.u32 2147483647, %v1288_v18 }
 0xc47   :  { %v1301_v51 = vor.u32 1.1754944e-38, %v1300_v44  ;;  %vm1299_vm15 = vcmp.eq.f32.partialorder %v1298_v46, 8.507059e+37 }
 0xc4b   :  { %v1751_v19 = vpop.eup %1750 }
 0xc4c   :  { %v1290_v21 = vmul.f32 %v1751_v19, %v1288_v18  ;;  %vm1295_vm12 = vweird.f32 %v1751_v19 }
 0xc4d   :  { %vm1296_vm14 = vmor %vm1294_vm13, %vm1295_vm12 }
 0xc4e   :  { %v1291_v6 = vsub.f32 1.0, %v1290_v21 }
 0xc50   :  { %v1292_v33 = vmul.f32 %v1751_v19, %v1291_v6 }
 0xc52   :  { %v1293_v60 = vadd.f32 %v1751_v19, %v1292_v33 }
 0xc54   :  { %v1297_v47 = vsel %vm1296_vm14, %v1751_v19, %v1293_v60 }
 0xc55   :  { %v2245_v50 = vsel %vm1299_vm15, %v1301_v51, %v1297_v47 }
 0xc56   :  { %v1305_v0 = vmul.f32 %v2245_v50, %v2197_v39 }
 0xc89   :  { %v1308_v49 = vpop.permute.xlu0 %1307 }
 0xc8a   :  { %v1310_v42 = vmul.f32 %v1308_v49, %v2245_v50  ;;  %v2281_v49 = vld [vmem:[#allocation2 + $0x140] sm:$0xff] }
 0xc91   :  { %v1324_v57 = vpop.permute.xlu0 %1323 }
 0xcac   :  { %v1033_v16 = vpop.permute.xlu1 %1032 }
 0xcad   :  { %v2241_v43 = vadd.f32 %v1033_v16, %v1025_v34 }
 0xcaf   :  { %1177 = vrot.lane.b32.xlu1 %v2241_v43, %s1845_s19 }
 0xcb6   :  { %v1159_v52 = vpop.xlane.xlu2 %1158 }
 0xcb7   :  { %1312 = vrot.lane.b32.xlu1 %v1310_v42, %s1839_s13  ;;  %1752 = vrcp.f32 %v1159_v52  ;;  %v1171_v3 = vand.u32 2147483648, %v1159_v52  ;;  %vm1165_vm0 = vweird.f32 %v1159_v52  ;;  %v1169_v7 = vand.u32 2147483647, %v1159_v52  ;;  %v62_v42 = vld [vmem:[#allocation2 + $0x138] sm:$0xff] }
 0xcb9   :  { %v1172_v26 = vor.u32 1.1754944e-38, %v1171_v3  ;;  %vm1170_vm4 = vcmp.eq.f32.partialorder %v1169_v7, 8.507059e+37 }
 0xcbd   :  { %v1753_v56 = vpop.eup %1752 }
 0xcbe   :  { %v1161_v58 = vmul.f32 %v1753_v56, %v1159_v52  ;;  %vm1166_vm2 = vweird.f32 %v1753_v56  ;;  %v61_v52 = vld [vmem:[#allocation2 + $0x130] sm:$0xff] }
 0xcbf   :  { %vm1167_vm3 = vmor %vm1165_vm0, %vm1166_vm2 }
 0xcc0   :  { %v1162_v11 = vsub.f32 1.0, %v1161_v58 }
 0xcc2   :  { %v1163_v59 = vmul.f32 %v1753_v56, %v1162_v11 }
 0xcc4   :  { %v1164_v61 = vadd.f32 %v1753_v56, %v1163_v59 }
 0xcc6   :  { %v1168_v24 = vsel %vm1167_vm3, %v1753_v56, %v1164_v61  ;;  %vm1491_vm3 = vcmask 64512  }
 0xcc7   :  { %v1173_v27 = vsel %vm1170_vm4, %v1172_v26, %v1168_v24 }
 0xcc8   :  { %v1174_v28 = vmul.f32 %v1747_v36, %v1173_v27 }
 0xcca   :  { %v1175_v29 = vmul.f32 %v1174_v28, %v2202_v5 }
 0xd21   :  { %v1178_v53 = vpop.permute.xlu1 %1177 }
 0xd22   :  { %v1180_v54 = vsel %vm202_vm8, %v1175_v29, %v1178_v53 }
 0xd23   :  { %1629 = vmatmul.msk.f32.vlgmr.msrb.gmra.mxu3 %vm284_vm5, %v1180_v54 }
 0xd24   :  { %1641 = vmatpush.msk.msrb.mxu3 %vm134_vm1, %v2281_v49 }
 0xd26   :  { %1535 = vmatpush.msrb.mxu3 %v62_v42 }
 0xd28   :  { %1536 = vmatpush.msrb.mxu3 %v61_v52 }
 0xd29   :  { %v1313_v38 = vpop.permute.xlu1 %1312 }
 0xd2a   :  { %v1315_v62 = vadd.f32 %v1313_v38, %v1305_v0 }
 0xd2c   :  { %v2255_v63 = vsel %vm130_vm7, %v1324_v57, %v1315_v62 }
 0xd2d   :  { %1635 = vmatmul.msk.f32.vlgmr.msra.gmra.mxu0 %vm202_vm8, %v2255_v63 }
 0xda6   :  { %v1201_v9 = vpop.f32.mrf.mxu3 }
 0xda7   :  { %v1202_v5 = vadd.f32 %v2259_v10, %v1201_v9 }
 0xda9   :  { %v1204_v14 = vmax.f32 %v1202_v5, 0.0 }
 0xdaa   :  { %v1347_v1 = vpop.f32.mrf.mxu0 }
 0xdab   :  { %v1348_v12 = vadd.f32 %v2219_v25, %v1347_v1  ;;  %1630 = vmatmul.msk.f32.vlgmr.msra.gmra.mxu2 %vm284_vm5, %v1204_v14 }
 0xdad   :  { %v1350_v39 = vmax.f32 %v1348_v12, 0.0 }
 0xdaf   :  { %1636 = vmatmul.msk.f32.vlgmr.msra.gmra.mxu3 %vm228_vm9, %v1350_v39 }
 0xe2e   :  { %v1225_v13 = vpop.f32.mrf.mxu2 }
 0xe2f   :  { %v1226_v8 = vadd.f32 %v2265_v15, %v1225_v13 }
 0xe31   :  { %1754 = vtanh.f32 %v1226_v8  ;;  %v1631_v41 = vmul.f32 -1.442695, %v1226_v8 }
 0xe32   :  { %v1371_v20 = vpop.f32.mrf.mxu3  ;;  %1756 = vtanh.f32 %v1315_v62 }
 0xe33   :  { %v1372_v22 = vadd.f32 %v2228_v55, %v1371_v20  ;;  %1758 = vpow2.f32 %v1631_v41 }
 0xe35   :  { %v1374_v17 = vsel %vm252_vm10, %v1372_v22, -inf }
 0xe36   :  { %1375 = vmax.xlane.f32.xlu0 %v1374_v17 }
 0xe37   :  { %v1755_v48 = vpop.eup %1754 }
 0xe38   :  { %1250 = vrot.lane.b32.xlu1 %v1755_v48, %s1843_s17  ;;  %v1757_v25 = vpop.eup %1756 }
 0xe39   :  { %v1759_v23 = vpop.eup %1758 }
 0xe3a   :  { %v1232_v30 = vadd.f32 1.0, %v1759_v23  ;;  %v1487_v23 = vrot.slane %v2281_v49, 4 }
 0xe3c   :  { %1760 = vrcp.f32 %v1232_v30  ;;  %v1244_v35 = vand.u32 2147483648, %v1232_v30  ;;  %vm1238_vm11 = vweird.f32 %v1232_v30  ;;  %v1242_v36 = vand.u32 2147483647, %v1232_v30 }
 0xe3e   :  { %v1245_v37 = vor.u32 1.1754944e-38, %v1244_v35  ;;  %vm1243_vm13 = vcmp.eq.f32.partialorder %v1242_v36, 8.507059e+37  ;;  %v67_v35 = vld [vmem:[#allocation2 + $0x160] sm:$0xff] }
 0xe42   :  { %v1761_v31 = vpop.eup %1760 }
 0xe43   :  { %v1234_v32 = vmul.f32 %v1761_v31, %v1232_v30  ;;  %vm1239_vm6 = vweird.f32 %v1761_v31  ;;  %v64_v30 = vld [vmem:[#allocation2 + $0x148] sm:$0xf] }
 0xe44   :  { %vm1240_vm12 = vmor %vm1238_vm11, %vm1239_vm6 }
 0xe45   :  { %v1235_v4 = vsub.f32 1.0, %v1234_v32 }
 0xe47   :  { %v1236_v45 = vmul.f32 %v1761_v31, %v1235_v4 }
 0xe49   :  { %v1237_v55 = vadd.f32 %v1761_v31, %v1236_v45 }
 0xe4a   :  { %1318 = vrot.lane.b32.xlu0 %v1757_v25, %s1839_s13 }
 0xe4b   :  { %v1241_v2 = vsel %vm1240_vm12, %v1761_v31, %v1237_v55  ;;  %v1488_v31 = vrot.slane %v64_v30, 4 }
 0xe4c   :  { %v1246_v40 = vsel %vm1243_vm13, %v1245_v37, %v1241_v2  ;;  %v66_v2 = vld [vmem:[#allocation2 + $0x158] sm:$0xff]  ;;  %v1662_v37 = vld [vmem:[#allocation2 + $0x150] ss:$0 sm:$0xff] }
 0xe4d   :  { %v1248_v46 = vmul.f32 %v1246_v40, %v2241_v43  ;;  %v1489_v32 = vsel %vm134_vm1, %v1487_v23, %v1488_v31 }
 0xe4e   :  { %1509 = vmatpush.msrb.mxu0 %v1489_v32 }
 0xe50   :  { %1562 = vmatpush.msra.mxu0 %v67_v35 }
 0xe52   :  { %1563 = vmatpush.msra.mxu0 %v66_v2 }
 0xea9   :  { %v1376_v21 = vpop.xlane.xlu0 %1375 }
 0xeaa   :  { %v1251_v18 = vpop.permute.xlu1 %1250  ;;  %v1377_v6 = vsub.f32 %v1372_v22, %v1376_v21 }
 0xeab   :  { %v1253_v19 = vmul.f32 %v1251_v18, %v1246_v40 }
 0xeac   :  { %v1378_v33 = vmul.f32 1.442695, %v1377_v6 }
 0xead   :  { %1255 = vrot.lane.b32.xlu1 %v1253_v19, %s1844_s18 }
 0xeae   :  { %1762 = vpow2.f32 %v1378_v33  ;;  %v1663_v33 = vld [vmem:[#allocation2 + $0x168] ss:$0 sm:$0xff] }
 0xeb4   :  { %v1763_v34 = vpop.eup %1762 }
 0xeb5   :  { %v1380_v16 = vsel %vm252_vm10, %v1763_v34, 0.0 }
 0xebc   :  { %v1319_v60 = vpop.permute.xlu0 %1318 }
 0xebd   :  { %v1321_v44 = vmul.f32 %v1319_v60, %v2245_v50 }
 0xed7   :  { %1381 = vadd.xlane.f32.xlu1 %v1380_v16 }
 0xef0   :  { %1515 = vrot.lane.b32.xlu1 %v1321_v44, %s1840_s14 }
 0xf1f   :  { %v1256_v47 = vpop.permute.xlu1 %1255 }
 0xf20   :  { %v2277_v51 = vadd.f32 %v1256_v47, %v1248_v46 }
 0xf22   :  { %1400 = vrot.lane.b32.xlu2 %v2277_v51, %s1845_s19 }
 0xf4a   :  { %v1382_v50 = vpop.xlane.xlu1 %1381 }
 0xf4b   :  { %1764 = vrcp.f32 %v1382_v50  ;;  %v1394_v3 = vand.u32 2147483648, %v1382_v50  ;;  %vm1388_vm14 = vweird.f32 %v1382_v50  ;;  %v1392_v7 = vand.u32 2147483647, %v1382_v50 }
 0xf4d   :  { %v1395_v26 = vor.u32 1.1754944e-38, %v1394_v3  ;;  %vm1393_vm2 = vcmp.eq.f32.partialorder %v1392_v7, 8.507059e+37 }
 0xf51   :  { %v1765_v56 = vpop.eup %1764 }
 0xf52   :  { %v1384_v58 = vmul.f32 %v1765_v56, %v1382_v50  ;;  %vm1389_vm10 = vweird.f32 %v1765_v56 }
 0xf53   :  { %vm1390_vm15 = vmor %vm1388_vm14, %vm1389_vm10 }
 0xf54   :  { %v1385_v11 = vsub.f32 1.0, %v1384_v58 }
 0xf56   :  { %v1386_v59 = vmul.f32 %v1765_v56, %v1385_v11 }
 0xf58   :  { %v1387_v61 = vadd.f32 %v1765_v56, %v1386_v59 }
 0xf5a   :  { %v1391_v24 = vsel %vm1390_vm15, %v1765_v56, %v1387_v61 }
 0xf5b   :  { %v1396_v27 = vsel %vm1393_vm2, %v1395_v26, %v1391_v24 }
 0xf5c   :  { %v1397_v28 = vmul.f32 %v1763_v34, %v1396_v27 }
 0xf5e   :  { %v1398_v29 = vmul.f32 %v1397_v28, %v2255_v63 }
 0xf62   :  { %v1516_v43 = vpop.permute.xlu1 %1515 }
 0xf63   :  { %1642 = vmatmul.msk.f32.vlgmr.msrb.gmra.mxu3 %vm130_vm7, %v1516_v43 }
 0xf7c   :  { %v1401_v53 = vpop.permute.xlu2 %1400 }
 0xf7d   :  { %v1403_v54 = vsel %vm202_vm8, %v1398_v29, %v1401_v53 }
 0xf7e   :  { %1637 = vmatmul.msk.f32.vlgmr.msra.gmra.mxu1 %vm284_vm5, %v1403_v54 }
 0xfe6   :  { %v1538_v40 = vpop.f32.mrf.mxu3 }
 0xffb   :  { %v1424_v0 = vpop.f32.mrf.mxu1 }
 0xffc   :  { %v1425_v38 = vadd.f32 %v2259_v10, %v1424_v0 }
 0xffe   :  { %v1427_v62 = vmax.f32 %v1425_v38, 0.0 }
0x1000   :  { %1638 = vmatmul.msk.f32.vlgmr.msrb.gmra.mxu2 %vm284_vm5, %v1427_v62 }
0x1083   :  { %v1448_v57 = vpop.f32.mrf.mxu2 }
0x1084   :  { %v1449_v9 = vadd.f32 %v2265_v15, %v1448_v57 }
0x1086   :  { %1766 = vtanh.f32 %v1449_v9  ;;  %v1639_v14 = vmul.f32 -1.442695, %v1449_v9 }
0x1088   :  { %1768 = vpow2.f32 %v1639_v14 }
0x108c   :  { %v1767_v5 = vpop.eup %1766 }
0x108d   :  { %1473 = vrot.lane.b32.xlu2 %v1767_v5, %s1843_s17 }
0x108e   :  { %v1769_v63 = vpop.eup %1768 }
0x108f   :  { %v1455_v1 = vadd.f32 1.0, %v1769_v63 }
0x1091   :  { %1770 = vrcp.f32 %v1455_v1  ;;  %v1467_v20 = vand.u32 2147483648, %v1455_v1  ;;  %vm1461_vm8 = vweird.f32 %v1455_v1  ;;  %v1465_v22 = vand.u32 2147483647, %v1455_v1 }
0x1093   :  { %v1468_v17 = vor.u32 1.1754944e-38, %v1467_v20  ;;  %vm1466_vm0 = vcmp.eq.f32.partialorder %v1465_v22, 8.507059e+37 }
0x1097   :  { %v1771_v12 = vpop.eup %1770 }
0x1098   :  { %v1457_v39 = vmul.f32 %v1771_v12, %v1455_v1  ;;  %vm1462_vm7 = vweird.f32 %v1771_v12 }
0x1099   :  { %vm1463_vm5 = vmor %vm1461_vm8, %vm1462_vm7 }
0x109a   :  { %v1458_v13 = vsub.f32 1.0, %v1457_v39 }
0x109c   :  { %v1459_v8 = vmul.f32 %v1771_v12, %v1458_v13 }
0x109e   :  { %v1460_v10 = vadd.f32 %v1771_v12, %v1459_v8 }
0x10a0   :  { %v1464_v15 = vsel %vm1463_vm5, %v1771_v12, %v1460_v10 }
0x10a1   :  { %v1469_v48 = vsel %vm1466_vm0, %v1468_v17, %v1464_v15 }
0x10a2   :  { %v1471_v4 = vmul.f32 %v1469_v48, %v2277_v51 }
0x10e7   :  { %v1474_v25 = vpop.permute.xlu2 %1473 }
0x10e8   :  { %v1476_v41 = vmul.f32 %v1474_v25, %v1469_v48 }
0x10ea   :  { %1478 = vrot.lane.b32.xlu2 %v1476_v41, %s1844_s18 }
0x1144   :  { %v1479_v45 = vpop.permute.xlu2 %1478 }
0x1145   :  { %v1481_v55 = vadd.f32 %v1479_v45, %v1471_v4 }
0x1147   :  { %1483 = vrot.lane.b32.xlu2 %v1481_v55, %s1844_s18 }
0x11a1   :  { %v1484_v36 = vpop.permute.xlu2 %1483 }
0x11a2   :  { %1640 = vmatmul.msk.f32.vlgmr.msrb.gmra.mxu0 %vm1491_vm3, %v1484_v36 }
0x121f   :  { %v1511_v18 = vpop.f32.mrf.mxu0 }
0x1220   :  { %v1539_v19 = vadd.f32 %v1538_v40, %v1511_v18 }
0x1222   :  { %v1542_v21 = vadd.f32 %v1662_v37, %v1539_v19 }
0x1224   :  { %v1543_v6 = vmax.f32 %v1542_v21, 0.0 }
0x1226   :  { %1643 = vmatmul.msk.f32.vlgmr.msra.gmra.mxu0 %vm228_vm9, %v1543_v6 }
0x12a3   :  { %v1565_v34 = vpop.f32.mrf.mxu0 }
0x12a4   :  { %v1566_v16 = vadd.f32 %v1663_v33, %v1565_v34 }
0x12a6   :  { %1568 = vst [vmem:[#allocation5] sm:$0xf] %v1566_v16 }
0x12a7   :  { %1579 = dma.vmem_to_hbm [thread:$0]  %s1575_s21, 64, %s1577_s24, [#allocation4]  }
0x12a8   :  { %1832 = dma.done.wait [#allocation4], 64  }
0x12a9   :  { %1833 = vsyncadd [#allocation4], 4294967232 }
0x12aa   :  { %1584 = vsyncpa [#allocation3], 1 }
0x12ab   :  { %1585 = vsyncpa [#allocation4], 1 }

</bundles_post_ra>
